<compile_context>
chip_gen: v7x
topology: tpu7x:2x2x1
jax: 0.10.0
libtpu: 0.0.40
codegen_flags: <defaults>
</compile_context>

<pallas_src>
import functools

import jax
import jax.numpy as jnp
from jax import lax
from jax.experimental import pallas as pl
from jax.experimental.pallas import tpu as pltpu


def _compare_exchange(arr, bit, take_min, j, total):
    """One bitonic compare-exchange along axis 0 via XLU rolls + VPU selects."""
    partner = jnp.where(
        bit,
        pltpu.roll(arr, shift=j, axis=0),          # arr[i - j]  (bit j of i set)
        pltpu.roll(arr, shift=total - j, axis=0),  # arr[i + j]  (bit j of i clear)
    )
    return jnp.where(take_min,
                     jnp.minimum(arr, partner),
                     jnp.maximum(arr, partner))


def _bitonic_sort_pair(a, b, idx, n, total):
    """Ascending bitonic sort of a and b ([total, l]) along axis 0.

    total = bt * n rows; each contiguous block of n rows is an independent
    sorting problem.  `idx` holds the LOCAL (mod-n) row index so the
    ascending/descending masks are correct per block, and because every
    compare distance j <= n/2, the roll partner selected by `bit` never
    crosses a block boundary (wrapped values only land in positions that the
    select discards).  x and y share all stage masks.
    """
    k = 2
    while k <= n:
        asc = (idx & k) == 0
        j = k // 2
        while j >= 1:
            bit = (idx & j) != 0
            take_min = asc != bit
            a = _compare_exchange(a, bit, take_min, j, total)
            b = _compare_exchange(b, bit, take_min, j, total)
            j //= 2
        k *= 2
    return a, b


def _abs_pow(diff, degree):
    deg = float(degree)
    if deg == 2.0:
        return diff * diff
    a = jnp.abs(diff)
    if deg == 1.0:
        return a
    if deg == int(deg) and 1.0 < deg <= 8.0:       # small integer powers on VALU
        p = a
        for _ in range(int(deg) - 1):
            p = p * a
        return p
    return a ** deg                                 # fractional degree: EUP path


def _gensw_kernel(x_ref, y_ref, t_ref, out_ref, *, degree, bt, n, d, lt, inv_l):
    lj = pl.program_id(1)

    @pl.when(lj == 0)
    def _init():
        out_ref[...] = jnp.zeros_like(out_ref)

    total = bt * n

    # ---- circular GRT distances (cheap: d VPU broadcast terms per batch) ----
    d2x_parts, d2y_parts = [], []
    for b in range(bt):
        xb = x_ref[b].astype(jnp.float32)   # [n, d]
        yb = y_ref[b].astype(jnp.float32)   # [n, d]
        tb = t_ref[b].astype(jnp.float32)   # [d, lt]  (L lane-dense)
        d2x = None
        d2y = None
        for c in range(d):
            tc = tb[c:c + 1, :]             # [1, lt]
            dx = xb[:, c:c + 1] - tc        # [n, lt]
            dy = yb[:, c:c + 1] - tc        # [n, lt]
            sqx = dx * dx
            sqy = dy * dy
            d2x = sqx if d2x is None else d2x + sqx
            d2y = sqy if d2y is None else d2y + sqy
        d2x_parts.append(d2x)
        d2y_parts.append(d2y)

    if bt == 1:
        d2x_all, d2y_all = d2x_parts[0], d2y_parts[0]
    else:
        # n % 8 == 0 is guaranteed by the bt heuristic, so this stacking is
        # (8,128)-tile aligned along the sublane axis.
        d2x_all = jnp.concatenate(d2x_parts, axis=0)    # [bt*n, lt]
        d2y_all = jnp.concatenate(d2y_parts, axis=0)

    xproj = jnp.sqrt(d2x_all)               # [bt*n, lt]
    yproj = jnp.sqrt(d2y_all)

    # ---- batch-fused torch.sort along the point axis (ascending) ----
    idx = lax.broadcasted_iota(jnp.int32, (total, lt), 0) & (n - 1)
    sx, sy = _bitonic_sort_pair(xproj, yproj, idx, n, total)

    pw = _abs_pow(sx - sy, degree)

    # Sum over points, batches in this tile, and this L tile; single
    # accumulate into the resident lane-dense output block.
    tile_sum = jnp.sum(jnp.sum(pw, axis=0, keepdims=True),
                       axis=1, keepdims=True)                    # [1, 1]
    out_ref[0] = out_ref[0] + jnp.broadcast_to(tile_sum, (1, 128))

    @pl.when(lj == pl.num_programs(1) - 1)
    def _finalize():
        out_ref[...] = out_ref[...] * inv_l     # mean over the L projections


def _choose_batch_tile(b, n):
    # Several batches per grid step amortize the ~0.35us/step overhead and let
    # the fused sort run on taller tiles; keep >=2 parallel steps when
    # possible (2 TensorCores on v7x) and stay inside a ~20 MiB working set.
    if n % 8 == 0:
        for cand in (8, 4, 2):
            if (b % cand == 0 and b // cand >= 2
                    and cand * n * 128 * 4 * 8 <= (20 << 20)):
                return cand
    return 1


def _choose_l_tile(l, n, bt):
    if l % 128 != 0:
        return l                                  # full-extent block is always legal
    lt = 512 if l % 512 == 0 else (256 if l % 256 == 0 else 128)
    lt = min(lt, l)
    # ~8 live [bt*n, lt] f32 tiles per step; budget sized against v5e's 16 MiB
    # default scoped VMEM (we raise the limit to 32 MiB, safe on v5e/v6e/v7x).
    while lt > 128 and bt * n * lt * 4 * 8 > (20 << 20):
        lt //= 2
    return lt


def gensw_loss(x, y, projections, degree=2.0):
    """Equivalent of GenSW(num_projs, g_type='circular').forward(x, y, degree=degree)."""
    b, n, d = x.shape
    l = projections.shape[1]
    assert n > 0 and (n & (n - 1)) == 0, (
        "num_points must be a power of 2 for the bitonic sort")
    # TODO(synk): pad the point axis with +inf sentinels to support non-power-of-2 N.

    bt = _choose_batch_tile(b, n)
    lt = _choose_l_tile(l, n, bt)

    theta_t = jnp.swapaxes(projections, 1, 2)     # [B, D, L], L lane-dense

    kernel = functools.partial(_gensw_kernel, degree=degree, bt=bt, n=n, d=d,
                               lt=lt, inv_l=1.0 / l)
    per_tile = pl.pallas_call(
        kernel,
        out_shape=jax.ShapeDtypeStruct((b // bt, 1, 128), jnp.float32),
        grid_spec=pltpu.PrefetchScalarGridSpec(
            num_scalar_prefetch=0,
            grid=(b // bt, l // lt),
            in_specs=[
                pl.BlockSpec((bt, n, d), lambda i, j: (i, 0, 0)),
                pl.BlockSpec((bt, n, d), lambda i, j: (i, 0, 0)),
                pl.BlockSpec((bt, d, lt), lambda i, j: (i, 0, j)),
            ],
            out_specs=pl.BlockSpec((1, 1, 128), lambda i, j: (i, 0, 0)),
        ),
        compiler_params=pltpu.CompilerParams(
            dimension_semantics=("parallel", "arbitrary"),
            vmem_limit_bytes=32 * 1024 * 1024),
    )(x, y, theta_t)

    # Each grid step already holds the sum over its bt batches; mean over batch.
    loss = jnp.sum(per_tile[:, 0, 0]) / b
    return {"loss": loss}


def minibatch_rand_projections(key, batchsize, dim, num_projections):
    """Deterministic stand-in for torch.randn + row normalization."""
    projections = jax.random.normal(key, (batchsize, num_projections, dim), jnp.float32)
    projections = projections / jnp.sqrt(
        jnp.sum(projections ** 2, axis=2, keepdims=True))
    return projections


def _reference_gensw(x, y, theta, degree):
    """Pure-JAX reference mirroring the PyTorch forward."""
    xproj = jnp.sqrt(jnp.sum((x[:, :, None, :] - theta[:, None, :, :]) ** 2, axis=3))
    yproj = jnp.sqrt(jnp.sum((y[:, :, None, :] - theta[:, None, :, :]) ** 2, axis=3))
    sx = jnp.sort(jnp.swapaxes(xproj, 1, 2), axis=2)
    sy = jnp.sort(jnp.swapaxes(yproj, 1, 2), axis=2)
    s = jnp.sum(jnp.abs(sx - sy) ** degree, axis=2)
    return jnp.mean(jnp.mean(s, axis=1), axis=0)


if __name__ == "__main__":
    key = jax.random.PRNGKey(0)
    kx, ky, kp = jax.random.split(key, 3)
    # B=4 exercises the batch-fused sort (bt=2); L=384 exercises the
    # multi-tile L reduction (lt=128, 3 accumulation steps + finalize).
    B, N, D, L = 4, 16, 3, 384      # batch, num_points, point dim, num_projs
    degree = 2.0

    x = jax.random.normal(kx, (B, N, D), jnp.float32)
    y = jax.random.normal(ky, (B, N, D), jnp.float32)
    projections = minibatch_rand_projections(kp, B, D, L)

    out = gensw_loss(x, y, projections, degree=degree)
    loss = jax.block_until_ready(out["loss"])

    ref = jax.block_until_ready(_reference_gensw(x, y, projections, degree))
    assert bool(jnp.isfinite(loss)), "non-finite loss"
    assert bool(jnp.allclose(loss, ref, rtol=1e-3, atol=1e-4)), (loss, ref)
    print("KERNEL_OK")
</pallas_src>

<mosaic_0001>
module attributes {stable_mosaic.version = 11 : i64} {
  func.func @_gensw_kernel(%arg0: i32, %arg1: i32, %arg2: memref<2x16x3xf32, #tpu.memory_space<vmem>>, %arg3: memref<2x16x3xf32, #tpu.memory_space<vmem>>, %arg4: memref<2x3x128xf32, #tpu.memory_space<vmem>>, %arg5: memref<1x1x128xf32, #tpu.memory_space<vmem>>) attributes {dimension_semantics = [#tpu.dimension_semantics<parallel>, #tpu.dimension_semantics<arbitrary>], iteration_bounds = array<i64: 2, 3>, scalar_prefetch = 0 : i64, scratch_operands = 0 : i64, tpu.core_type = #tpu.core_type<tc>, window_params = [{transform_indices = @transform_0, window_bounds = array<i64: 2, 16, 3>}, {transform_indices = @transform_1, window_bounds = array<i64: 2, 16, 3>}, {transform_indices = @transform_2, window_bounds = array<i64: 2, 3, 128>}, {transform_indices = @transform_3, window_bounds = array<i64: 1, 1, 128>}]} {
    %c0_i32 = arith.constant 0 : i32
    %0 = arith.cmpi eq, %arg1, %c0_i32 : i32
    %1 = arith.extui %0 : i1 to i32
    %c0_i32_0 = arith.constant 0 : i32
    %2 = arith.cmpi ne, %1, %c0_i32_0 : i32
    scf.if %2 {
      %cst_85 = arith.constant 0.000000e+00 : f32
      %299 = vector.broadcast %cst_85 : f32 to vector<1x1x128xf32>
      %c0_86 = arith.constant 0 : index
      %c0_87 = arith.constant 0 : index
      %c0_88 = arith.constant 0 : index
      %300 = vector.load %arg5[%c0_86, %c0_87, %c0_88] : memref<1x1x128xf32, #tpu.memory_space<vmem>>, vector<1x1x128xf32>
      tpu.vector_store %arg5[%c0_86, %c0_87, %c0_88], %299 {strides = array<i32>} : memref<1x1x128xf32, #tpu.memory_space<vmem>>, vector<1x1x128xf32>,
    } else {
    }
    %c0 = arith.constant 0 : index
    %c0_1 = arith.constant 0 : index
    %c0_2 = arith.constant 0 : index
    %3 = vector.load %arg2[%c0, %c0_1, %c0_2] : memref<2x16x3xf32, #tpu.memory_space<vmem>>, vector<1x16x3xf32>
    %4 = vector.shape_cast %3 : vector<1x16x3xf32> to vector<16x3xf32>
    %c0_3 = arith.constant 0 : index
    %c0_4 = arith.constant 0 : index
    %c0_5 = arith.constant 0 : index
    %5 = vector.load %arg3[%c0_3, %c0_4, %c0_5] : memref<2x16x3xf32, #tpu.memory_space<vmem>>, vector<1x16x3xf32>
    %6 = vector.shape_cast %5 : vector<1x16x3xf32> to vector<16x3xf32>
    %c0_6 = arith.constant 0 : index
    %c0_7 = arith.constant 0 : index
    %c0_8 = arith.constant 0 : index
    %7 = vector.load %arg4[%c0_6, %c0_7, %c0_8] : memref<2x3x128xf32, #tpu.memory_space<vmem>>, vector<1x3x128xf32>
    %8 = vector.shape_cast %7 : vector<1x3x128xf32> to vector<3x128xf32>
    %9 = vector.extract_strided_slice %8 {offsets = [0, 0], sizes = [1, 128], strides = [1, 1]} : vector<3x128xf32> to vector<1x128xf32>
    %10 = vector.extract_strided_slice %4 {offsets = [0, 0], sizes = [16, 1], strides = [1, 1]} : vector<16x3xf32> to vector<16x1xf32>
    %11 = vector.broadcast %10 : vector<16x1xf32> to vector<16x128xf32>
    %12 = vector.broadcast %9 : vector<1x128xf32> to vector<16x128xf32>
    %13 = arith.subf %11, %12 : vector<16x128xf32>
    %14 = vector.extract_strided_slice %6 {offsets = [0, 0], sizes = [16, 1], strides = [1, 1]} : vector<16x3xf32> to vector<16x1xf32>
    %15 = vector.broadcast %14 : vector<16x1xf32> to vector<16x128xf32>
    %16 = vector.broadcast %9 : vector<1x128xf32> to vector<16x128xf32>
    %17 = arith.subf %15, %16 : vector<16x128xf32>
    %18 = arith.mulf %13, %13 : vector<16x128xf32>
    %19 = arith.mulf %17, %17 : vector<16x128xf32>
    %20 = vector.extract_strided_slice %8 {offsets = [1, 0], sizes = [1, 128], strides = [1, 1]} : vector<3x128xf32> to vector<1x128xf32>
    %21 = vector.extract_strided_slice %4 {offsets = [0, 1], sizes = [16, 1], strides = [1, 1]} : vector<16x3xf32> to vector<16x1xf32>
    %22 = vector.broadcast %21 : vector<16x1xf32> to vector<16x128xf32>
    %23 = vector.broadcast %20 : vector<1x128xf32> to vector<16x128xf32>
    %24 = arith.subf %22, %23 : vector<16x128xf32>
    %25 = vector.extract_strided_slice %6 {offsets = [0, 1], sizes = [16, 1], strides = [1, 1]} : vector<16x3xf32> to vector<16x1xf32>
    %26 = vector.broadcast %25 : vector<16x1xf32> to vector<16x128xf32>
    %27 = vector.broadcast %20 : vector<1x128xf32> to vector<16x128xf32>
    %28 = arith.subf %26, %27 : vector<16x128xf32>
    %29 = arith.mulf %24, %24 : vector<16x128xf32>
    %30 = arith.mulf %28, %28 : vector<16x128xf32>
    %31 = arith.addf %18, %29 : vector<16x128xf32>
    %32 = arith.addf %19, %30 : vector<16x128xf32>
    %33 = vector.extract_strided_slice %8 {offsets = [2, 0], sizes = [1, 128], strides = [1, 1]} : vector<3x128xf32> to vector<1x128xf32>
    %34 = vector.extract_strided_slice %4 {offsets = [0, 2], sizes = [16, 1], strides = [1, 1]} : vector<16x3xf32> to vector<16x1xf32>
    %35 = vector.broadcast %34 : vector<16x1xf32> to vector<16x128xf32>
    %36 = vector.broadcast %33 : vector<1x128xf32> to vector<16x128xf32>
    %37 = arith.subf %35, %36 : vector<16x128xf32>
    %38 = vector.extract_strided_slice %6 {offsets = [0, 2], sizes = [16, 1], strides = [1, 1]} : vector<16x3xf32> to vector<16x1xf32>
    %39 = vector.broadcast %38 : vector<16x1xf32> to vector<16x128xf32>
    %40 = vector.broadcast %33 : vector<1x128xf32> to vector<16x128xf32>
    %41 = arith.subf %39, %40 : vector<16x128xf32>
    %42 = arith.mulf %37, %37 : vector<16x128xf32>
    %43 = arith.mulf %41, %41 : vector<16x128xf32>
    %44 = arith.addf %31, %42 : vector<16x128xf32>
    %45 = arith.addf %32, %43 : vector<16x128xf32>
    %c1 = arith.constant 1 : index
    %c0_9 = arith.constant 0 : index
    %c0_10 = arith.constant 0 : index
    %46 = vector.load %arg2[%c1, %c0_9, %c0_10] : memref<2x16x3xf32, #tpu.memory_space<vmem>>, vector<1x16x3xf32>
    %47 = vector.shape_cast %46 : vector<1x16x3xf32> to vector<16x3xf32>
    %c1_11 = arith.constant 1 : index
    %c0_12 = arith.constant 0 : index
    %c0_13 = arith.constant 0 : index
    %48 = vector.load %arg3[%c1_11, %c0_12, %c0_13] : memref<2x16x3xf32, #tpu.memory_space<vmem>>, vector<1x16x3xf32>
    %49 = vector.shape_cast %48 : vector<1x16x3xf32> to vector<16x3xf32>
    %c1_14 = arith.constant 1 : index
    %c0_15 = arith.constant 0 : index
    %c0_16 = arith.constant 0 : index
    %50 = vector.load %arg4[%c1_14, %c0_15, %c0_16] : memref<2x3x128xf32, #tpu.memory_space<vmem>>, vector<1x3x128xf32>
    %51 = vector.shape_cast %50 : vector<1x3x128xf32> to vector<3x128xf32>
    %52 = vector.extract_strided_slice %51 {offsets = [0, 0], sizes = [1, 128], strides = [1, 1]} : vector<3x128xf32> to vector<1x128xf32>
    %53 = vector.extract_strided_slice %47 {offsets = [0, 0], sizes = [16, 1], strides = [1, 1]} : vector<16x3xf32> to vector<16x1xf32>
    %54 = vector.broadcast %53 : vector<16x1xf32> to vector<16x128xf32>
    %55 = vector.broadcast %52 : vector<1x128xf32> to vector<16x128xf32>
    %56 = arith.subf %54, %55 : vector<16x128xf32>
    %57 = vector.extract_strided_slice %49 {offsets = [0, 0], sizes = [16, 1], strides = [1, 1]} : vector<16x3xf32> to vector<16x1xf32>
    %58 = vector.broadcast %57 : vector<16x1xf32> to vector<16x128xf32>
    %59 = vector.broadcast %52 : vector<1x128xf32> to vector<16x128xf32>
    %60 = arith.subf %58, %59 : vector<16x128xf32>
    %61 = arith.mulf %56, %56 : vector<16x128xf32>
    %62 = arith.mulf %60, %60 : vector<16x128xf32>
    %63 = vector.extract_strided_slice %51 {offsets = [1, 0], sizes = [1, 128], strides = [1, 1]} : vector<3x128xf32> to vector<1x128xf32>
    %64 = vector.extract_strided_slice %47 {offsets = [0, 1], sizes = [16, 1], strides = [1, 1]} : vector<16x3xf32> to vector<16x1xf32>
    %65 = vector.broadcast %64 : vector<16x1xf32> to vector<16x128xf32>
    %66 = vector.broadcast %63 : vector<1x128xf32> to vector<16x128xf32>
    %67 = arith.subf %65, %66 : vector<16x128xf32>
    %68 = vector.extract_strided_slice %49 {offsets = [0, 1], sizes = [16, 1], strides = [1, 1]} : vector<16x3xf32> to vector<16x1xf32>
    %69 = vector.broadcast %68 : vector<16x1xf32> to vector<16x128xf32>
    %70 = vector.broadcast %63 : vector<1x128xf32> to vector<16x128xf32>
    %71 = arith.subf %69, %70 : vector<16x128xf32>
    %72 = arith.mulf %67, %67 : vector<16x128xf32>
    %73 = arith.mulf %71, %71 : vector<16x128xf32>
    %74 = arith.addf %61, %72 : vector<16x128xf32>
    %75 = arith.addf %62, %73 : vector<16x128xf32>
    %76 = vector.extract_strided_slice %51 {offsets = [2, 0], sizes = [1, 128], strides = [1, 1]} : vector<3x128xf32> to vector<1x128xf32>
    %77 = vector.extract_strided_slice %47 {offsets = [0, 2], sizes = [16, 1], strides = [1, 1]} : vector<16x3xf32> to vector<16x1xf32>
    %78 = vector.broadcast %77 : vector<16x1xf32> to vector<16x128xf32>
    %79 = vector.broadcast %76 : vector<1x128xf32> to vector<16x128xf32>
    %80 = arith.subf %78, %79 : vector<16x128xf32>
    %81 = vector.extract_strided_slice %49 {offsets = [0, 2], sizes = [16, 1], strides = [1, 1]} : vector<16x3xf32> to vector<16x1xf32>
    %82 = vector.broadcast %81 : vector<16x1xf32> to vector<16x128xf32>
    %83 = vector.broadcast %76 : vector<1x128xf32> to vector<16x128xf32>
    %84 = arith.subf %82, %83 : vector<16x128xf32>
    %85 = arith.mulf %80, %80 : vector<16x128xf32>
    %86 = arith.mulf %84, %84 : vector<16x128xf32>
    %87 = arith.addf %74, %85 : vector<16x128xf32>
    %88 = arith.addf %75, %86 : vector<16x128xf32>
    %89 = tpu.concatenate %44, %87 in 0 : vector<16x128xf32>, vector<16x128xf32> -> vector<32x128xf32>
    %90 = tpu.concatenate %45, %88 in 0 : vector<16x128xf32>, vector<16x128xf32> -> vector<32x128xf32>
    %91 = math.sqrt %89 : vector<32x128xf32>
    %92 = math.sqrt %90 : vector<32x128xf32>
    %93 = tpu.iota {dimensions = array<i32: 0>} : vector<32x128xi32>
    %c15_i32 = arith.constant 15 : i32
    %94 = vector.broadcast %c15_i32 : i32 to vector<32x128xi32>
    %95 = arith.andi %93, %94 : vector<32x128xi32>
    %c2_i32 = arith.constant 2 : i32
    %96 = vector.broadcast %c2_i32 : i32 to vector<32x128xi32>
    %97 = arith.andi %95, %96 : vector<32x128xi32>
    %c0_i32_17 = arith.constant 0 : i32
    %98 = vector.broadcast %c0_i32_17 : i32 to vector<32x128xi32>
    %99 = arith.cmpi eq, %97, %98 : vector<32x128xi32>
    %c1_i32 = arith.constant 1 : i32
    %100 = vector.broadcast %c1_i32 : i32 to vector<32x128xi32>
    %101 = arith.andi %95, %100 : vector<32x128xi32>
    %c0_i32_18 = arith.constant 0 : i32
    %102 = vector.broadcast %c0_i32_18 : i32 to vector<32x128xi32>
    %103 = arith.cmpi ne, %101, %102 : vector<32x128xi32>
    %104 = arith.xori %99, %103 : vector<32x128xi1>
    %c1_i32_19 = arith.constant 1 : i32
    %105 = tpu.dynamic_rotate %91 by %c1_i32_19 dim 0 : vector<32x128xf32>, i32 -> vector<32x128xf32>
    %c31_i32 = arith.constant 31 : i32
    %106 = tpu.dynamic_rotate %91 by %c31_i32 dim 0 : vector<32x128xf32>, i32 -> vector<32x128xf32>
    %107 = arith.select %103, %105, %106 : vector<32x128xi1>, vector<32x128xf32>
    %108 = arith.minimumf %91, %107 : vector<32x128xf32>
    %109 = arith.maximumf %91, %107 : vector<32x128xf32>
    %110 = arith.select %104, %108, %109 : vector<32x128xi1>, vector<32x128xf32>
    %c1_i32_20 = arith.constant 1 : i32
    %111 = tpu.dynamic_rotate %92 by %c1_i32_20 dim 0 : vector<32x128xf32>, i32 -> vector<32x128xf32>
    %c31_i32_21 = arith.constant 31 : i32
    %112 = tpu.dynamic_rotate %92 by %c31_i32_21 dim 0 : vector<32x128xf32>, i32 -> vector<32x128xf32>
    %113 = arith.select %103, %111, %112 : vector<32x128xi1>, vector<32x128xf32>
    %114 = arith.minimumf %92, %113 : vector<32x128xf32>
    %115 = arith.maximumf %92, %113 : vector<32x128xf32>
    %116 = arith.select %104, %114, %115 : vector<32x128xi1>, vector<32x128xf32>
    %c4_i32 = arith.constant 4 : i32
    %117 = vector.broadcast %c4_i32 : i32 to vector<32x128xi32>
    %118 = arith.andi %95, %117 : vector<32x128xi32>
    %c0_i32_22 = arith.constant 0 : i32
    %119 = vector.broadcast %c0_i32_22 : i32 to vector<32x128xi32>
    %120 = arith.cmpi eq, %118, %119 : vector<32x128xi32>
    %c2_i32_23 = arith.constant 2 : i32
    %121 = vector.broadcast %c2_i32_23 : i32 to vector<32x128xi32>
    %122 = arith.andi %95, %121 : vector<32x128xi32>
    %c0_i32_24 = arith.constant 0 : i32
    %123 = vector.broadcast %c0_i32_24 : i32 to vector<32x128xi32>
    %124 = arith.cmpi ne, %122, %123 : vector<32x128xi32>
    %125 = arith.xori %120, %124 : vector<32x128xi1>
    %c2_i32_25 = arith.constant 2 : i32
    %126 = tpu.dynamic_rotate %110 by %c2_i32_25 dim 0 : vector<32x128xf32>, i32 -> vector<32x128xf32>
    %c30_i32 = arith.constant 30 : i32
    %127 = tpu.dynamic_rotate %110 by %c30_i32 dim 0 : vector<32x128xf32>, i32 -> vector<32x128xf32>
    %128 = arith.select %124, %126, %127 : vector<32x128xi1>, vector<32x128xf32>
    %129 = arith.minimumf %110, %128 : vector<32x128xf32>
    %130 = arith.maximumf %110, %128 : vector<32x128xf32>
    %131 = arith.select %125, %129, %130 : vector<32x128xi1>, vector<32x128xf32>
    %c2_i32_26 = arith.constant 2 : i32
    %132 = tpu.dynamic_rotate %116 by %c2_i32_26 dim 0 : vector<32x128xf32>, i32 -> vector<32x128xf32>
    %c30_i32_27 = arith.constant 30 : i32
    %133 = tpu.dynamic_rotate %116 by %c30_i32_27 dim 0 : vector<32x128xf32>, i32 -> vector<32x128xf32>
    %134 = arith.select %124, %132, %133 : vector<32x128xi1>, vector<32x128xf32>
    %135 = arith.minimumf %116, %134 : vector<32x128xf32>
    %136 = arith.maximumf %116, %134 : vector<32x128xf32>
    %137 = arith.select %125, %135, %136 : vector<32x128xi1>, vector<32x128xf32>
    %c1_i32_28 = arith.constant 1 : i32
    %138 = vector.broadcast %c1_i32_28 : i32 to vector<32x128xi32>
    %139 = arith.andi %95, %138 : vector<32x128xi32>
    %c0_i32_29 = arith.constant 0 : i32
    %140 = vector.broadcast %c0_i32_29 : i32 to vector<32x128xi32>
    %141 = arith.cmpi ne, %139, %140 : vector<32x128xi32>
    %142 = arith.xori %120, %141 : vector<32x128xi1>
    %c1_i32_30 = arith.constant 1 : i32
    %143 = tpu.dynamic_rotate %131 by %c1_i32_30 dim 0 : vector<32x128xf32>, i32 -> vector<32x128xf32>
    %c31_i32_31 = arith.constant 31 : i32
    %144 = tpu.dynamic_rotate %131 by %c31_i32_31 dim 0 : vector<32x128xf32>, i32 -> vector<32x128xf32>
    %145 = arith.select %141, %143, %144 : vector<32x128xi1>, vector<32x128xf32>
    %146 = arith.minimumf %131, %145 : vector<32x128xf32>
    %147 = arith.maximumf %131, %145 : vector<32x128xf32>
    %148 = arith.select %142, %146, %147 : vector<32x128xi1>, vector<32x128xf32>
    %c1_i32_32 = arith.constant 1 : i32
    %149 = tpu.dynamic_rotate %137 by %c1_i32_32 dim 0 : vector<32x128xf32>, i32 -> vector<32x128xf32>
    %c31_i32_33 = arith.constant 31 : i32
    %150 = tpu.dynamic_rotate %137 by %c31_i32_33 dim 0 : vector<32x128xf32>, i32 -> vector<32x128xf32>
    %151 = arith.select %141, %149, %150 : vector<32x128xi1>, vector<32x128xf32>
    %152 = arith.minimumf %137, %151 : vector<32x128xf32>
    %153 = arith.maximumf %137, %151 : vector<32x128xf32>
    %154 = arith.select %142, %152, %153 : vector<32x128xi1>, vector<32x128xf32>
    %c8_i32 = arith.constant 8 : i32
    %155 = vector.broadcast %c8_i32 : i32 to vector<32x128xi32>
    %156 = arith.andi %95, %155 : vector<32x128xi32>
    %c0_i32_34 = arith.constant 0 : i32
    %157 = vector.broadcast %c0_i32_34 : i32 to vector<32x128xi32>
    %158 = arith.cmpi eq, %156, %157 : vector<32x128xi32>
    %c4_i32_35 = arith.constant 4 : i32
    %159 = vector.broadcast %c4_i32_35 : i32 to vector<32x128xi32>
    %160 = arith.andi %95, %159 : vector<32x128xi32>
    %c0_i32_36 = arith.constant 0 : i32
    %161 = vector.broadcast %c0_i32_36 : i32 to vector<32x128xi32>
    %162 = arith.cmpi ne, %160, %161 : vector<32x128xi32>
    %163 = arith.xori %158, %162 : vector<32x128xi1>
    %c4_i32_37 = arith.constant 4 : i32
    %164 = tpu.dynamic_rotate %148 by %c4_i32_37 dim 0 : vector<32x128xf32>, i32 -> vector<32x128xf32>
    %c28_i32 = arith.constant 28 : i32
    %165 = tpu.dynamic_rotate %148 by %c28_i32 dim 0 : vector<32x128xf32>, i32 -> vector<32x128xf32>
    %166 = arith.select %162, %164, %165 : vector<32x128xi1>, vector<32x128xf32>
    %167 = arith.minimumf %148, %166 : vector<32x128xf32>
    %168 = arith.maximumf %148, %166 : vector<32x128xf32>
    %169 = arith.select %163, %167, %168 : vector<32x128xi1>, vector<32x128xf32>
    %c4_i32_38 = arith.constant 4 : i32
    %170 = tpu.dynamic_rotate %154 by %c4_i32_38 dim 0 : vector<32x128xf32>, i32 -> vector<32x128xf32>
    %c28_i32_39 = arith.constant 28 : i32
    %171 = tpu.dynamic_rotate %154 by %c28_i32_39 dim 0 : vector<32x128xf32>, i32 -> vector<32x128xf32>
    %172 = arith.select %162, %170, %171 : vector<32x128xi1>, vector<32x128xf32>
    %173 = arith.minimumf %154, %172 : vector<32x128xf32>
    %174 = arith.maximumf %154, %172 : vector<32x128xf32>
    %175 = arith.select %163, %173, %174 : vector<32x128xi1>, vector<32x128xf32>
    %c2_i32_40 = arith.constant 2 : i32
    %176 = vector.broadcast %c2_i32_40 : i32 to vector<32x128xi32>
    %177 = arith.andi %95, %176 : vector<32x128xi32>
    %c0_i32_41 = arith.constant 0 : i32
    %178 = vector.broadcast %c0_i32_41 : i32 to vector<32x128xi32>
    %179 = arith.cmpi ne, %177, %178 : vector<32x128xi32>
    %180 = arith.xori %158, %179 : vector<32x128xi1>
    %c2_i32_42 = arith.constant 2 : i32
    %181 = tpu.dynamic_rotate %169 by %c2_i32_42 dim 0 : vector<32x128xf32>, i32 -> vector<32x128xf32>
    %c30_i32_43 = arith.constant 30 : i32
    %182 = tpu.dynamic_rotate %169 by %c30_i32_43 dim 0 : vector<32x128xf32>, i32 -> vector<32x128xf32>
    %183 = arith.select %179, %181, %182 : vector<32x128xi1>, vector<32x128xf32>
    %184 = arith.minimumf %169, %183 : vector<32x128xf32>
    %185 = arith.maximumf %169, %183 : vector<32x128xf32>
    %186 = arith.select %180, %184, %185 : vector<32x128xi1>, vector<32x128xf32>
    %c2_i32_44 = arith.constant 2 : i32
    %187 = tpu.dynamic_rotate %175 by %c2_i32_44 dim 0 : vector<32x128xf32>, i32 -> vector<32x128xf32>
    %c30_i32_45 = arith.constant 30 : i32
    %188 = tpu.dynamic_rotate %175 by %c30_i32_45 dim 0 : vector<32x128xf32>, i32 -> vector<32x128xf32>
    %189 = arith.select %179, %187, %188 : vector<32x128xi1>, vector<32x128xf32>
    %190 = arith.minimumf %175, %189 : vector<32x128xf32>
    %191 = arith.maximumf %175, %189 : vector<32x128xf32>
    %192 = arith.select %180, %190, %191 : vector<32x128xi1>, vector<32x128xf32>
    %c1_i32_46 = arith.constant 1 : i32
    %193 = vector.broadcast %c1_i32_46 : i32 to vector<32x128xi32>
    %194 = arith.andi %95, %193 : vector<32x128xi32>
    %c0_i32_47 = arith.constant 0 : i32
    %195 = vector.broadcast %c0_i32_47 : i32 to vector<32x128xi32>
    %196 = arith.cmpi ne, %194, %195 : vector<32x128xi32>
    %197 = arith.xori %158, %196 : vector<32x128xi1>
    %c1_i32_48 = arith.constant 1 : i32
    %198 = tpu.dynamic_rotate %186 by %c1_i32_48 dim 0 : vector<32x128xf32>, i32 -> vector<32x128xf32>
    %c31_i32_49 = arith.constant 31 : i32
    %199 = tpu.dynamic_rotate %186 by %c31_i32_49 dim 0 : vector<32x128xf32>, i32 -> vector<32x128xf32>
    %200 = arith.select %196, %198, %199 : vector<32x128xi1>, vector<32x128xf32>
    %201 = arith.minimumf %186, %200 : vector<32x128xf32>
    %202 = arith.maximumf %186, %200 : vector<32x128xf32>
    %203 = arith.select %197, %201, %202 : vector<32x128xi1>, vector<32x128xf32>
    %c1_i32_50 = arith.constant 1 : i32
    %204 = tpu.dynamic_rotate %192 by %c1_i32_50 dim 0 : vector<32x128xf32>, i32 -> vector<32x128xf32>
    %c31_i32_51 = arith.constant 31 : i32
    %205 = tpu.dynamic_rotate %192 by %c31_i32_51 dim 0 : vector<32x128xf32>, i32 -> vector<32x128xf32>
    %206 = arith.select %196, %204, %205 : vector<32x128xi1>, vector<32x128xf32>
    %207 = arith.minimumf %192, %206 : vector<32x128xf32>
    %208 = arith.maximumf %192, %206 : vector<32x128xf32>
    %209 = arith.select %197, %207, %208 : vector<32x128xi1>, vector<32x128xf32>
    %c16_i32 = arith.constant 16 : i32
    %210 = vector.broadcast %c16_i32 : i32 to vector<32x128xi32>
    %211 = arith.andi %95, %210 : vector<32x128xi32>
    %c0_i32_52 = arith.constant 0 : i32
    %212 = vector.broadcast %c0_i32_52 : i32 to vector<32x128xi32>
    %213 = arith.cmpi eq, %211, %212 : vector<32x128xi32>
    %c8_i32_53 = arith.constant 8 : i32
    %214 = vector.broadcast %c8_i32_53 : i32 to vector<32x128xi32>
    %215 = arith.andi %95, %214 : vector<32x128xi32>
    %c0_i32_54 = arith.constant 0 : i32
    %216 = vector.broadcast %c0_i32_54 : i32 to vector<32x128xi32>
    %217 = arith.cmpi ne, %215, %216 : vector<32x128xi32>
    %218 = arith.xori %213, %217 : vector<32x128xi1>
    %c8_i32_55 = arith.constant 8 : i32
    %219 = tpu.dynamic_rotate %203 by %c8_i32_55 dim 0 : vector<32x128xf32>, i32 -> vector<32x128xf32>
    %c24_i32 = arith.constant 24 : i32
    %220 = tpu.dynamic_rotate %203 by %c24_i32 dim 0 : vector<32x128xf32>, i32 -> vector<32x128xf32>
    %221 = arith.select %217, %219, %220 : vector<32x128xi1>, vector<32x128xf32>
    %222 = arith.minimumf %203, %221 : vector<32x128xf32>
    %223 = arith.maximumf %203, %221 : vector<32x128xf32>
    %224 = arith.select %218, %222, %223 : vector<32x128xi1>, vector<32x128xf32>
    %c8_i32_56 = arith.constant 8 : i32
    %225 = tpu.dynamic_rotate %209 by %c8_i32_56 dim 0 : vector<32x128xf32>, i32 -> vector<32x128xf32>
    %c24_i32_57 = arith.constant 24 : i32
    %226 = tpu.dynamic_rotate %209 by %c24_i32_57 dim 0 : vector<32x128xf32>, i32 -> vector<32x128xf32>
    %227 = arith.select %217, %225, %226 : vector<32x128xi1>, vector<32x128xf32>
    %228 = arith.minimumf %209, %227 : vector<32x128xf32>
    %229 = arith.maximumf %209, %227 : vector<32x128xf32>
    %230 = arith.select %218, %228, %229 : vector<32x128xi1>, vector<32x128xf32>
    %c4_i32_58 = arith.constant 4 : i32
    %231 = vector.broadcast %c4_i32_58 : i32 to vector<32x128xi32>
    %232 = arith.andi %95, %231 : vector<32x128xi32>
    %c0_i32_59 = arith.constant 0 : i32
    %233 = vector.broadcast %c0_i32_59 : i32 to vector<32x128xi32>
    %234 = arith.cmpi ne, %232, %233 : vector<32x128xi32>
    %235 = arith.xori %213, %234 : vector<32x128xi1>
    %c4_i32_60 = arith.constant 4 : i32
    %236 = tpu.dynamic_rotate %224 by %c4_i32_60 dim 0 : vector<32x128xf32>, i32 -> vector<32x128xf32>
    %c28_i32_61 = arith.constant 28 : i32
    %237 = tpu.dynamic_rotate %224 by %c28_i32_61 dim 0 : vector<32x128xf32>, i32 -> vector<32x128xf32>
    %238 = arith.select %234, %236, %237 : vector<32x128xi1>, vector<32x128xf32>
    %239 = arith.minimumf %224, %238 : vector<32x128xf32>
    %240 = arith.maximumf %224, %238 : vector<32x128xf32>
    %241 = arith.select %235, %239, %240 : vector<32x128xi1>, vector<32x128xf32>
    %c4_i32_62 = arith.constant 4 : i32
    %242 = tpu.dynamic_rotate %230 by %c4_i32_62 dim 0 : vector<32x128xf32>, i32 -> vector<32x128xf32>
    %c28_i32_63 = arith.constant 28 : i32
    %243 = tpu.dynamic_rotate %230 by %c28_i32_63 dim 0 : vector<32x128xf32>, i32 -> vector<32x128xf32>
    %244 = arith.select %234, %242, %243 : vector<32x128xi1>, vector<32x128xf32>
    %245 = arith.minimumf %230, %244 : vector<32x128xf32>
    %246 = arith.maximumf %230, %244 : vector<32x128xf32>
    %247 = arith.select %235, %245, %246 : vector<32x128xi1>, vector<32x128xf32>
    %c2_i32_64 = arith.constant 2 : i32
    %248 = vector.broadcast %c2_i32_64 : i32 to vector<32x128xi32>
    %249 = arith.andi %95, %248 : vector<32x128xi32>
    %c0_i32_65 = arith.constant 0 : i32
    %250 = vector.broadcast %c0_i32_65 : i32 to vector<32x128xi32>
    %251 = arith.cmpi ne, %249, %250 : vector<32x128xi32>
    %252 = arith.xori %213, %251 : vector<32x128xi1>
    %c2_i32_66 = arith.constant 2 : i32
    %253 = tpu.dynamic_rotate %241 by %c2_i32_66 dim 0 : vector<32x128xf32>, i32 -> vector<32x128xf32>
    %c30_i32_67 = arith.constant 30 : i32
    %254 = tpu.dynamic_rotate %241 by %c30_i32_67 dim 0 : vector<32x128xf32>, i32 -> vector<32x128xf32>
    %255 = arith.select %251, %253, %254 : vector<32x128xi1>, vector<32x128xf32>
    %256 = arith.minimumf %241, %255 : vector<32x128xf32>
    %257 = arith.maximumf %241, %255 : vector<32x128xf32>
    %258 = arith.select %252, %256, %257 : vector<32x128xi1>, vector<32x128xf32>
    %c2_i32_68 = arith.constant 2 : i32
    %259 = tpu.dynamic_rotate %247 by %c2_i32_68 dim 0 : vector<32x128xf32>, i32 -> vector<32x128xf32>
    %c30_i32_69 = arith.constant 30 : i32
    %260 = tpu.dynamic_rotate %247 by %c30_i32_69 dim 0 : vector<32x128xf32>, i32 -> vector<32x128xf32>
    %261 = arith.select %251, %259, %260 : vector<32x128xi1>, vector<32x128xf32>
    %262 = arith.minimumf %247, %261 : vector<32x128xf32>
    %263 = arith.maximumf %247, %261 : vector<32x128xf32>
    %264 = arith.select %252, %262, %263 : vector<32x128xi1>, vector<32x128xf32>
    %c1_i32_70 = arith.constant 1 : i32
    %265 = vector.broadcast %c1_i32_70 : i32 to vector<32x128xi32>
    %266 = arith.andi %95, %265 : vector<32x128xi32>
    %c0_i32_71 = arith.constant 0 : i32
    %267 = vector.broadcast %c0_i32_71 : i32 to vector<32x128xi32>
    %268 = arith.cmpi ne, %266, %267 : vector<32x128xi32>
    %269 = arith.xori %213, %268 : vector<32x128xi1>
    %c1_i32_72 = arith.constant 1 : i32
    %270 = tpu.dynamic_rotate %258 by %c1_i32_72 dim 0 : vector<32x128xf32>, i32 -> vector<32x128xf32>
    %c31_i32_73 = arith.constant 31 : i32
    %271 = tpu.dynamic_rotate %258 by %c31_i32_73 dim 0 : vector<32x128xf32>, i32 -> vector<32x128xf32>
    %272 = arith.select %268, %270, %271 : vector<32x128xi1>, vector<32x128xf32>
    %273 = arith.minimumf %258, %272 : vector<32x128xf32>
    %274 = arith.maximumf %258, %272 : vector<32x128xf32>
    %275 = arith.select %269, %273, %274 : vector<32x128xi1>, vector<32x128xf32>
    %c1_i32_74 = arith.constant 1 : i32
    %276 = tpu.dynamic_rotate %264 by %c1_i32_74 dim 0 : vector<32x128xf32>, i32 -> vector<32x128xf32>
    %c31_i32_75 = arith.constant 31 : i32
    %277 = tpu.dynamic_rotate %264 by %c31_i32_75 dim 0 : vector<32x128xf32>, i32 -> vector<32x128xf32>
    %278 = arith.select %268, %276, %277 : vector<32x128xi1>, vector<32x128xf32>
    %279 = arith.minimumf %264, %278 : vector<32x128xf32>
    %280 = arith.maximumf %264, %278 : vector<32x128xf32>
    %281 = arith.select %269, %279, %280 : vector<32x128xi1>, vector<32x128xf32>
    %282 = arith.subf %275, %281 : vector<32x128xf32>
    %283 = arith.mulf %282, %282 : vector<32x128xf32>
    %cst = arith.constant dense<0.000000e+00> : vector<128xf32>
    %284 = vector.multi_reduction <add>, %283, %cst [0] : vector<32x128xf32> to vector<128xf32>
    %285 = vector.shape_cast %284 : vector<128xf32> to vector<1x128xf32>
    %cst_76 = arith.constant dense<0.000000e+00> : vector<1xf32>
    %286 = vector.multi_reduction <add>, %285, %cst_76 [1] : vector<1x128xf32> to vector<1xf32>
    %287 = vector.shape_cast %286 : vector<1xf32> to vector<1x1xf32>
    %c0_77 = arith.constant 0 : index
    %c0_78 = arith.constant 0 : index
    %c0_79 = arith.constant 0 : index
    %288 = vector.load %arg5[%c0_77, %c0_78, %c0_79] : memref<1x1x128xf32, #tpu.memory_space<vmem>>, vector<1x1x128xf32>
    %289 = vector.shape_cast %288 : vector<1x1x128xf32> to vector<1x128xf32>
    %290 = vector.shape_cast %287 : vector<1x1xf32> to vector<1x1xf32>
    %291 = vector.broadcast %290 : vector<1x1xf32> to vector<1x128xf32>
    %292 = arith.addf %289, %291 : vector<1x128xf32>
    %c0_80 = arith.constant 0 : index
    %c0_81 = arith.constant 0 : index
    %c0_82 = arith.constant 0 : index
    %293 = vector.load %arg5[%c0_80, %c0_81, %c0_82] : memref<1x1x128xf32, #tpu.memory_space<vmem>>, vector<1x1x128xf32>
    %294 = vector.shape_cast %293 : vector<1x1x128xf32> to vector<1x128xf32>
    %295 = vector.shape_cast %292 : vector<1x128xf32> to vector<1x1x128xf32>
    tpu.vector_store %arg5[%c0_80, %c0_81, %c0_82], %295 {strides = array<i32>} : memref<1x1x128xf32, #tpu.memory_space<vmem>>, vector<1x1x128xf32>,
    %c2_i32_83 = arith.constant 2 : i32
    %296 = arith.cmpi eq, %arg1, %c2_i32_83 : i32
    %297 = arith.extui %296 : i1 to i32
    %c0_i32_84 = arith.constant 0 : i32
    %298 = arith.cmpi ne, %297, %c0_i32_84 : i32
    scf.if %298 {
      %c0_85 = arith.constant 0 : index
      %c0_86 = arith.constant 0 : index
      %c0_87 = arith.constant 0 : index
      %299 = vector.load %arg5[%c0_85, %c0_86, %c0_87] : memref<1x1x128xf32, #tpu.memory_space<vmem>>, vector<1x1x128xf32>
      %cst_88 = arith.constant 0.00260416674 : f32
      %300 = vector.broadcast %cst_88 : f32 to vector<1x1x128xf32>
      %301 = arith.mulf %299, %300 : vector<1x1x128xf32>
      %c0_89 = arith.constant 0 : index
      %c0_90 = arith.constant 0 : index
      %c0_91 = arith.constant 0 : index
      %302 = vector.load %arg5[%c0_89, %c0_90, %c0_91] : memref<1x1x128xf32, #tpu.memory_space<vmem>>, vector<1x1x128xf32>
      tpu.vector_store %arg5[%c0_89, %c0_90, %c0_91], %301 {strides = array<i32>} : memref<1x1x128xf32, #tpu.memory_space<vmem>>, vector<1x1x128xf32>,
    } else {
    }
    return
  }
  func.func @transform_0(%arg0: i32, %arg1: i32) -> (i32, i32, i32) {
    %c0_i32 = arith.constant 0 : i32
    %c0_i32_0 = arith.constant 0 : i32
    %c0_i32_1 = arith.constant 0 : i32
    return %arg0, %c0_i32, %c0_i32_0 : i32, i32, i32
  }
  func.func @transform_1(%arg0: i32, %arg1: i32) -> (i32, i32, i32) {
    %c0_i32 = arith.constant 0 : i32
    %c0_i32_0 = arith.constant 0 : i32
    %c0_i32_1 = arith.constant 0 : i32
    return %arg0, %c0_i32, %c0_i32_0 : i32, i32, i32
  }
  func.func @transform_2(%arg0: i32, %arg1: i32) -> (i32, i32, i32) {
    %c0_i32 = arith.constant 0 : i32
    %c0_i32_0 = arith.constant 0 : i32
    return %arg0, %c0_i32, %arg1 : i32, i32, i32
  }
  func.func @transform_3(%arg0: i32, %arg1: i32) -> (i32, i32, i32) {
    %c0_i32 = arith.constant 0 : i32
    %c0_i32_0 = arith.constant 0 : i32
    %c0_i32_1 = arith.constant 0 : i32
    return %arg0, %c0_i32, %c0_i32_0 : i32, i32, i32
  }
}

</mosaic_0001>

<bundles_post_ra>
// kernel: tpu_custom_call.1
= control target key start
LH: loop header
LB: loop body
LE: loop exit
PB: predicated region body
PF: predicated region fallthrough
CT: control target
= control target key end

     0   :  { %s3131_s0 = inlined_call_operand.vmem [shape: f32[4,16,3], index: 0, kind: input, shape index: {}]   ;;  %s3132_s1 = inlined_call_operand.vmem [shape: f32[4,16,3], index: 1, kind: input, shape index: {}]   ;;  %s3133_s2 = inlined_call_operand.vmem [shape: f32[4,3,384], index: 2, kind: input, shape index: {}]   ;;  %s3134_s3 = inlined_call_operand.hbm [shape: f32[2,1,128], index: 3, kind: output, shape index: {}]  }
   0x1   :  { %3182 = sst [smem:[#allocation6_spill]] %s3133_s2 }
   0x2   :  { %8 = vsyncpa [#allocation4], 0 }
   0x3   :  { %10 = vsyncpa [#allocation4 + $0x1], 0  ;;  %s1652_s12 = smov 0   ;;  %s1654_s13 = smov 0  }
   0x4   :  { %s1656_s14 = smov 0   ;;  %s1658_s15 = smov 0  }
   0x5   :  { %s1660_s16 = smov 0   ;;  %s1662_s17 = smov 0  }
   0x6   :  { %s1664_s18 = smov 0   ;;  %s1666_s19 = smov 0  }
   0x7   :  { %s1668_s20 = smov 0   ;;  %s1670_s21 = smov 0  }
   0x8 LB: > { %s1369_s22 = sadd.s32 4294967295, %s1624_s21   ;;  %s1370_s23 = sadd.s32 4294967294, %s1624_s21   ;;  %s1624_s21 = sphi %s1670_s21, %s16_s21   ;;  %s1620_s20 = sphi %s1668_s20, %s3416_s20   ;;  %s1616_s19 = sphi %s1666_s19, %s3415_s19   ;;  %s1612_s18 = sphi %s1664_s18, %s3414_s18   ;;  %s1608_s17 = sphi %s1662_s17, %s3413_s17   ;;  %s1604_s16 = sphi %s1660_s16, %s3412_s16   ;;  %s1600_s15 = sphi %s1658_s15, %s3411_s15   ;;  %s1596_s14 = sphi %s1656_s14, %s3410_s14   ;;  %s1592_s13 = sphi %s1654_s13, %s3409_s13   ;;  %s1588_s12 = sphi %s1652_s12, %s3408_s12  }
   0x9   : > { %s25_s24 = sadd.s32 1, %s1616_s19  ;;  %s28_s25 = sadd.s32 1, %s1620_s20 }
   0xa   : > { %p26_p0 = scmp.ge.s32.totalorder %s25_s24, 3  ;;  %s89_s26 = sadd.s32 1, %s1604_s16 }
   0xb   : > { %p96_p1 = scmp.ne.s32.totalorder %s1604_s16, %s1600_s15  ;;  %p97_p2 = scmp.eq.s32.totalorder %s1624_s21, 0 }
   0xc   : > { %s3418_s24 = smov (%p26_p0, %s25_s24), 0  ;;  %s3420_s25 = smov (!%p26_p0, %s28_s25), %s1620_s20 }
   0xd   : > { %s85_s27 = ssub.s32 %s1616_s19, %s3418_s24  ;;  %p1715_p3 = por %p97_p2, %p96_p1 }
   0xe   : > { %p30_p4 = scmp.ge.s32.totalorder %s3420_s25, 2  ;;  %s115_s29 = sadd.s32 1, %s1596_s14 }
   0xf   : > { %p125_p5 = scmp.ne.s32.totalorder %s1596_s14, %s1592_s13  ;;  %p126_p6 = scmp.eq.s32.totalorder %s1369_s22, 5 }
  0x10   : > { %s3422_s25 = smov (%p30_p4, %s3420_s25), 0  ;;  %p131_p8 = scmp.ne.s32.totalorder %s1592_s13, %s1588_s12 }
  0x11   : > { %p1724_p7 = por %p126_p6, %p125_p5  ;;  %s84_s4 = ssub.s32 %s1620_s20, %s3422_s25 }
  0x12   : > { %p132_p9 = scmp.eq.s32.totalorder %s1370_s23, 5  ;;  %s86_s5 = sor.u32 %s85_s27, %s84_s4 }
  0x13   : > { %p113_p10 = scmp.eq.s32.totalorder %s84_s4, 0  ;;  %p87_p11 = scmp.eq.s32.totalorder %s86_s5, 0 }
  0x14   : > { %p1732_p12 = por %p132_p9, %p131_p8  ;;  %p1372_p13 = scmp.ge.s32.totalorder %s1624_s21, 6 }
  0x15   : > { %s1737_s7 = scalar_select %p113_p10, %s1596_s14, %s115_s29  }
  0x16   : > { %s1740_s8 = scalar_select %p87_p11, %s1604_s16, %s89_s26  }
  0x17   : > { %148 = sbr.rel (%p1372_p13) target bundleno = 41 (0x29), region = 16 }
  0x1e   : > { %171 = sbr.rel (!%p1715_p3) target bundleno = 41 (0x29), region = 28  ;;  %s173_s9 = sand.u32 (%p1715_p3), 1, %s1604_s16  }
  0x1f   : > { %s1397_s10 = smul.u32 (%p1715_p3), 6, %s1620_s20  ;;  %s1373_s11 = sshll.u32 (%p1715_p3), %s173_s9, 3 }
  0x20   : > { %s3186_s2 = sld [smem:[#allocation6_spill]] (%p1715_p3)  ;;  %s175_s26 = scalar_lea.vmem (%p1715_p3), [#allocation2], %s1373_s11 }
  0x21   : > { %s178_s22 = sadd.s32 (%p1715_p3), %s1616_s19, %s1397_s10 }
  0x22   : > { %s1376_s23 = sshll.u32 (%p1715_p3), %s178_s22, 2 }
  0x26   : > { %s180_s29 = scalar_lea.vmem %s3186_s2, %s1376_s23 }
  0x27   : > { %v196_v0 = vld [vmem:[%s180_s29] sm:$0xf]  ;;  %v198_v1 = vld [vmem:[%s180_s29 + $0xc] sm:$0xf] }
  0x28   : > { %197 = vst [vmem:[%s175_s26] sm:$0xf] %v196_v0  ;;  %199 = vst [vmem:[%s175_s26 + $0x4] sm:$0xf] %v198_v1 }
  0x29 PF: > { %p1377_p0 = scmp.ge.s32.totalorder %s1624_s21, 1  ;;  %p225_p1 = scmp.lt.s32.totalorder %s1624_s21, 7 }
  0x2b   : > { %p226_p2 = pnand %p1377_p0, %p225_p1 }
  0x2c   : > { %s232_s28 = sand.u32 (!%p226_p2), 1, %s1600_s15   ;;  %s264_s5 = sand.u32 (!%p226_p2), 1, %s1592_s13  }
  0x2d   : > { %229 = sbr.rel (%p226_p2) target bundleno = 625 (0x271), region = 69  ;;  %s1755_s9 = sshll.u32 (!%p226_p2), %s232_s28, 3 }
  0x2e   : > { %s1379_s10 = sshll.u32 (!%p226_p2), %s1612_s18, 1  ;;  %s234_s2 = scalar_lea.vmem (!%p226_p2), [#allocation2], %s1755_s9 }
  0x2f   : > { %p267_p3 = scmp.lt.s32.totalorder (!%p226_p2), %s1379_s10, 3  ;;  %s1769_s15 = scalar_lea.vmem (!%p226_p2), [#allocation3], %s264_s5 }
  0x30   : > { %p1385_p4 = scmp.ne.s32.totalorder (!%p226_p2), %s1608_s17, 0 }
  0x34   : > { %s3424_s10 = smov (!%p267_p3, %s1379_s10), 3  ;;  %284 = sbr.rel (%p1385_p4) target bundleno = 59 (0x3b), region = 77 }
  0x35   : > { %s1395_s11 = sshll.u32 %s3424_s10, 4  ;;  %v1626_v2 = vmov (!%p1385_p4), 0.0  }
  0x36   : > { %s271_s27 = scalar_lea.vmem %s3131_s0, %s1395_s11  ;;  %s1764_s26 = scalar_lea.vmem %s3132_s1, %s1395_s11  ;;  %285 = vst [vmem:[%s1769_s15] sm:$0x1] (!%p1385_p4), %v1626_v2 }
  0x3b PF: > { %v288_v3 = vld [vmem:[%s1764_s26] sm:$0xff]  ;;  %v1627_v5 = vmov 0   ;;  %v289_v6 = vld [vmem:[%s1764_s26 + $0x8] sm:$0xff]  ;;  %v1387_v8 = vld [vmem:[%s271_s27 + $0x18] sm:$0xff]  ;;  %v1628_v9 = vmov 1   ;;  %v1629_v13 = vmov 2   ;;  %v301_v20 = vlaneseq }
  0x3c   : > { %v286_v4 = vld [vmem:[%s271_s27] sm:$0xff]  ;;  %1491 = vset.pattern.permute.xlu1 %v1627_v5  ;;  %1490 = vset.pattern.permute.xlu0 %v1627_v5  ;;  %v287_v7 = vld [vmem:[%s271_s27 + $0x8] sm:$0xff]  ;;  %v1386_v10 = vld [vmem:[%s271_s27 + $0x10] sm:$0xff]  ;;  %p1391_p5 = scmp.ne.s32.totalorder %s1608_s17, 2 }
  0x3d   : > { %309 = vperm.xlu1 %1491, %v288_v3   ;;  %293 = vperm.xlu0 %1490, %v286_v4   ;;  %v1388_v11 = vld [vmem:[%s1764_s26 + $0x10] sm:$0xff]  ;;  %v1389_v12 = vld [vmem:[%s1764_s26 + $0x18] sm:$0xff]  ;;  %v1783_v23 = vshrl.u32 %v301_v20, 7  ;;  %v290_v29 = vld [vmem:[%s234_s2] sm:$0x7] }
  0x3e   : > { %v1390_v34 = vld [vmem:[%s234_s2 + $0x4] sm:$0x7] }
  0x3f   : > { %v333_v26 = vsub.s32 1, %v1783_v23  ;;  %v303_v27 = vsub.s32 0, %v1783_v23  ;;  %v365_v32 = vsub.s32 2, %v1783_v23  ;;  %vm3135_vm2 = vcmp.lt.s32.totalorder %v1783_v23, 1 }
  0x40   : > { %vm3136_vm3 = vcmp.lt.s32.totalorder %v1783_v23, 7 }
  0x41   : > { %314 = vperm.xlu1 %1491, %v289_v6   ;;  %298 = vperm.xlu0 %1490, %v287_v7   ;;  %v334_v31 = vrot.slane %v290_v29, %v333_v26  ;;  %v304_v33 = vrot.slane %v290_v29, %v303_v27  ;;  %v438_v36 = vrot.slane %v1390_v34, %v333_v26 }
  0x42   : > { %v366_v40 = vrot.slane %v290_v29, %v365_v32  ;;  %v408_v41 = vrot.slane %v1390_v34, %v303_v27  ;;  %v1792_v48 = vrot.slane %v1390_v34, %v365_v32 }
  0x45   : > { %1492 = vset.pattern.permute.xlu1 %v1628_v9  ;;  %402 = vperm.xlu0 %1490, %v1387_v8  }
  0x46   : > { %328 = vperm.xlu1 %1492, %v287_v7  }
  0x49   : > { %1494 = vset.pattern.permute.xlu0 %v1628_v9 }
  0x4a   : > { %338 = vperm.xlu1 %1492, %v288_v3   ;;  %324 = vperm.xlu0 %1494, %v286_v4  }
  0x4e   : > { %1493 = vset.pattern.permute.xlu1 %v1627_v5  ;;  %342 = vperm.xlu0 %1494, %v289_v6  }
  0x4f   : > { %397 = vperm.xlu1 %1493, %v1386_v10  }
  0x52   : > { %428 = vperm.xlu0 %1494, %v1386_v10  }
  0x53   : > { %413 = vperm.xlu1 %1493, %v1388_v11  }
  0x56   : > { %446 = vperm.xlu0 %1494, %v1389_v12  }
  0x57   : > { %418 = vperm.xlu1 %1493, %v1389_v12  }
  0x5a   : > { %1497 = vset.pattern.permute.xlu0 %v1629_v13 }
  0x5b   : > { %1495 = vset.pattern.permute.xlu1 %v1628_v9  ;;  %360 = vperm.xlu0 %1497, %v287_v7  }
  0x5c   : > { %432 = vperm.xlu1 %1495, %v1387_v8  }
  0x5f   : > { %460 = vperm.xlu0 %1497, %v1386_v10  }
  0x60   : > { %442 = vperm.xlu1 %1495, %v1388_v11  }
  0x63   : > { %474 = vperm.xlu0 %1497, %v1388_v11  }
  0x64   : > { %1496 = vset.pattern.permute.xlu1 %v1629_v13 }
  0x65   : > { %356 = vperm.xlu1 %1496, %v286_v4  }
  0x69   : > { %370 = vperm.xlu1 %1496, %v288_v3  }
  0x6d   : > { %374 = vperm.xlu1 %1496, %v289_v6  }
  0x71   : > { %464 = vperm.xlu1 %1496, %v1387_v8  }
  0x75   : > { %478 = vperm.xlu1 %1496, %v1389_v12   ;;  %v549_v12 = vadd.s32 8, %v1783_v23 }
  0xbc   : > { %v1777_v14 = vpop.permute.xlu1 %309  ;;  %v294_v15 = vpop.permute.xlu0 %293 }
  0xbd   : > { %v305_v57 = vsub.f32 %v294_v15, %v304_v33  ;;  %v317_v13 = vsub.f32 %v1777_v14, %v304_v33  ;;  %v550_v14 = vadd.s32 16, %v1783_v23 }
  0xbf   : > { %v319_v4 = vmul.f32 %v305_v57, %v305_v57  ;;  %v321_v29 = vmul.f32 %v317_v13, %v317_v13 }
  0xc0   : > { %v1779_v16 = vpop.permute.xlu1 %314  ;;  %v299_v17 = vpop.permute.xlu0 %298 }
  0xc1   : > { %v306_v38 = vsub.f32 %v299_v17, %v304_v33  ;;  %v318_v26 = vsub.f32 %v1779_v16, %v304_v33 }
  0xc3   : > { %v320_v44 = vmul.f32 %v306_v38, %v306_v38 }
  0xc4   : > { %v1781_v18 = vpop.permute.xlu0 %402 }
  0xc5   : > { %v329_v19 = vpop.permute.xlu1 %328  ;;  %v410_v38 = vsub.f32 %v1781_v18, %v408_v41 }
  0xc6   : > { %v336_v39 = vsub.f32 %v329_v19, %v334_v31 }
  0xc8   : > { %v348_v45 = vmul.f32 %v336_v39, %v336_v39 }
  0xc9   : > { %v339_v21 = vpop.permute.xlu1 %338  ;;  %v325_v22 = vpop.permute.xlu0 %324 }
  0xca   : > { %v352_v54 = vadd.f32 %v348_v45, %v320_v44  ;;  %v335_v58 = vsub.f32 %v325_v22, %v334_v31  ;;  %v345_v9 = vsub.f32 %v339_v21, %v334_v31  ;;  %v1807_v21 = vand.u32 15, %v549_v12 }
  0xcc   : > { %v347_v5 = vmul.f32 %v335_v58, %v335_v58 }
  0xcd   : > { %v343_v24 = vpop.permute.xlu0 %342 }
  0xce   : > { %v398_v25 = vpop.permute.xlu1 %397  ;;  %v346_v15 = vsub.f32 %v343_v24, %v334_v31  ;;  %v351_v20 = vadd.f32 %v347_v5, %v319_v4  ;;  %v3187_v5 = vmov 0 }
  0xcf   : > { %v409_v49 = vsub.f32 %v398_v25, %v408_v41  ;;  %v349_v25 = vmul.f32 %v345_v9, %v345_v9 }
  0xd1   : > { %v429_v28 = vpop.permute.xlu0 %428  ;;  %v423_v59 = vmul.f32 %v409_v49, %v409_v49  ;;  %v353_v16 = vadd.f32 %v349_v25, %v321_v29  ;;  %v1819_v49 = vand.u32 15, %v1783_v23 }
  0xd2   : > { %v414_v30 = vpop.permute.xlu1 %413  ;;  %v439_v42 = vsub.f32 %v429_v28, %v438_v36 }
  0xd3   : > { %v421_v52 = vsub.f32 %v414_v30, %v408_v41  ;;  %v350_v30 = vmul.f32 %v346_v15, %v346_v15  ;;  %v564_v58 = vand.u32 1, %v1819_v49  ;;  %v556_v25 = vand.u32 2, %v1819_v49 }
  0xd4   : > { %v451_v51 = vmul.f32 %v439_v42, %v439_v42  ;;  %v322_v42 = vmul.f32 %v318_v26, %v318_v26 }
  0xd5   : > { %v447_v35 = vpop.permute.xlu0 %446  ;;  %v425_v63 = vmul.f32 %v421_v52, %v421_v52 }
  0xd6   : > { %v419_v37 = vpop.permute.xlu1 %418  ;;  %v455_v62 = vadd.f32 %v451_v51, %v423_v59  ;;  %v450_v31 = vsub.f32 %v447_v35, %v438_v36  ;;  %v1821_v35 = vand.u32 15, %v550_v14  ;;  %v424_v51 = vmul.f32 %v410_v38, %v410_v38 }
  0xd7   : > { %v422_v24 = vsub.f32 %v419_v37, %v408_v41  ;;  %v354_v37 = vadd.f32 %v350_v30, %v322_v42 }
  0xd8   : > { %v558_v29 = vand.u32 2, %v1821_v35 }
  0xda   : > { %v361_v43 = vpop.permute.xlu0 %360 }
  0xdb   : > { %v368_v46 = vsub.f32 %v361_v43, %v366_v40  ;;  %v433_v47 = vpop.permute.xlu1 %432  ;;  %v551_v43 = vadd.s32 24, %v1783_v23 }
  0xdc   : > { %v440_v32 = vsub.f32 %v433_v47, %v438_v36  ;;  %v426_v47 = vmul.f32 %v422_v24, %v422_v24 }
  0xdd   : > { %v380_v50 = vmul.f32 %v368_v46, %v368_v46  ;;  %v1831_v57 = vand.u32 15, %v551_v43 }
  0xde   : > { %v461_v53 = vpop.permute.xlu0 %460  ;;  %v452_v18 = vmul.f32 %v440_v32, %v440_v32 }
  0xdf   : > { %v471_v55 = vsub.f32 %v461_v53, %v1792_v48  ;;  %v443_v56 = vpop.permute.xlu1 %442  ;;  %v1795_v61 = vadd.f32 %v380_v50, %v352_v54  ;;  %v454_v50 = vmul.f32 %v450_v31, %v450_v31 }
  0xe0   : > { %v449_v60 = vsub.f32 %v443_v56, %v438_v36  ;;  %v557_v56 = vand.u32 2, %v1807_v21 }
  0xe1   : > { %v483_v0 = vmul.f32 %v471_v55, %v471_v55  ;;  %1498 = vrsqrt.f32 %v1795_v61  ;;  %v458_v59 = vadd.f32 %v454_v50, %v426_v47  ;;  %vm500_vm0 = vcmp.eq.f32.partialorder %v1795_v61, inf }
  0xe2   : > { %v453_v1 = vmul.f32 %v449_v60, %v449_v60  ;;  %v475_v2 = vpop.permute.xlu0 %474  ;;  %v456_v60 = vadd.f32 %v452_v18, %v424_v51  ;;  %vm502_vm1 = vcmp.eq.f32.partialorder %v1795_v61, 0.0  ;;  %vm1869_vm9 = vcmp.eq.s32.totalorder %v557_v56, 0 }
  0xe3   : > { %v481_v3 = vsub.f32 %v475_v2, %v1792_v48  ;;  %v1798_v6 = vadd.f32 %v483_v0, %v455_v62  ;;  %v566_v62 = vand.u32 1, %v1821_v35  ;;  %v645_v47 = vand.u32 4, %v1831_v57 }
  0xe4   : > { %v457_v7 = vadd.f32 %v453_v1, %v425_v63  ;;  %v357_v8 = vpop.permute.xlu1 %356  ;;  %v503_v1 = vand.u32 2147483648, %v1795_v61  ;;  %v3193_v51 = vmov 0 }
  0xe5   : > { %v485_v10 = vmul.f32 %v481_v3, %v481_v3  ;;  %v367_v11 = vsub.f32 %v357_v8, %v366_v40  ;;  %1500 = vrsqrt.f32 %v1798_v6  ;;  %vm507_vm4 = vcmp.eq.f32.partialorder %v1798_v6, inf }
  0xe6   : > { %vm509_vm6 = vcmp.eq.f32.partialorder %v1798_v6, 0.0  ;;  %v510_v9 = vand.u32 2147483648, %v1798_v6 }
  0xe7   : > { %v1804_v17 = vadd.f32 %v485_v10, %v457_v7  ;;  %v379_v19 = vmul.f32 %v367_v11, %v367_v11 }
  0xe8   : > { %v371_v22 = vpop.permute.xlu1 %370 }
  0xe9   : > { %v1809_v27 = vadd.f32 %v379_v19, %v351_v20  ;;  %v377_v28 = vsub.f32 %v371_v22, %v366_v40  ;;  %1502 = vrsqrt.f32 %v1804_v17  ;;  %vm535_vm10 = vcmp.eq.f32.partialorder %v1804_v17, inf }
  0xea   : > { %vm537_vm12 = vcmp.eq.f32.partialorder %v1804_v17, 0.0 }
  0xeb   : > { %1504 = vrsqrt.f32 %v1809_v27  ;;  %v381_v33 = vmul.f32 %v377_v28, %v377_v28  ;;  %v1499_v44 = vpop.eup %1498  ;;  %vm493_vm7 = vcmp.eq.f32.partialorder %v1809_v27, inf  ;;  %vm495_vm8 = vcmp.eq.f32.partialorder %v1809_v27, 0.0 }
  0xec   : > { %v375_v34 = vpop.permute.xlu1 %374  ;;  %v499_v52 = vmul.f32 %v1499_v44, %v1795_v61  ;;  %v496_v11 = vand.u32 2147483648, %v1809_v27 }
  0xed   : > { %v378_v39 = vsub.f32 %v375_v34, %v366_v40  ;;  %v1816_v45 = vadd.f32 %v381_v33, %v353_v16  ;;  %v565_v40 = vand.u32 1, %v1807_v21  ;;  %v538_v34 = vand.u32 2147483648, %v1804_v17 }
  0xee   : > { %v501_v3 = vsel %vm500_vm0, %v1795_v61, %v499_v52  ;;  %v567_v61 = vand.u32 1, %v1831_v57  ;;  %vm1919_vm0 = vcmp.eq.s32.totalorder %v556_v25, 0  ;;  %v3197_v52 = vmov 0 }
  0xef   : > { %v382_v46 = vmul.f32 %v378_v39, %v378_v39  ;;  %v1501_v36 = vpop.eup %1500  ;;  %1506 = vrsqrt.f32 %v1816_v45  ;;  %vm1844_vm5 = vcmp.ne.s32.totalorder %v565_v40, 0  ;;  %v1859_v15 = vsel %vm502_vm1, %v503_v1, %v501_v3 }
  0xf0   : > { %v465_v41 = vpop.permute.xlu1 %464  ;;  %v506_v53 = vmul.f32 %v1501_v36, %v1798_v6  ;;  %v3188_v5 = vsel %vm1844_vm5, 4294967295, %v3187_v5  ;;  %v577_v14 = vrot.slane %v1859_v15, 7  ;;  %vm521_vm11 = vcmp.eq.f32.partialorder %v1816_v45, inf }
  0xf1   : > { %v1827_v54 = vadd.f32 %v382_v46, %v354_v37  ;;  %v472_v55 = vsub.f32 %v465_v41, %v1792_v48  ;;  %v586_v16 = vrot.slane %v1859_v15, 1  ;;  %v524_v42 = vand.u32 2147483648, %v1816_v45 }
  0xf2   : > { %v508_v4 = vsel %vm507_vm4, %v1798_v6, %v506_v53  ;;  %vm523_vm13 = vcmp.eq.f32.partialorder %v1816_v45, 0.0  ;;  %v3191_v41 = vmov 0  ;;  %vm1925_vm1 = vcmp.eq.s32.totalorder %v558_v29, 0 }
  0xf3   : > { %1508 = vrsqrt.f32 %v1827_v54  ;;  %v1503_v0 = vpop.eup %1502  ;;  %v484_v7 = vmul.f32 %v472_v55, %v472_v55  ;;  %vm528_vm14 = vcmp.eq.f32.partialorder %v1827_v54, inf  ;;  %v531_v37 = vand.u32 2147483648, %v1827_v54 }
  0xf4   : > { %v479_v63 = vpop.permute.xlu1 %478  ;;  %v534_v19 = vmul.f32 %v1503_v0, %v1804_v17  ;;  %vm530_vm15 = vcmp.eq.f32.partialorder %v1827_v54, 0.0  ;;  %v3192_v41 = vsel %vm1919_vm0, 4294967295, %v3191_v41  ;;  %v3194_v51 = vsel %vm1925_vm1, 4294967295, %v3193_v51 }
  0xf5   : > { %v1505_v2 = vpop.eup %1504  ;;  %v482_v8 = vsub.f32 %v479_v63, %v1792_v48  ;;  %v1855_v12 = vadd.f32 %v484_v7, %v456_v60  ;;  %v1861_v48 = vsel %vm509_vm6, %v510_v9, %v508_v4  ;;  %vm1931_vm4 = vcmp.ne.s32.totalorder %v564_v58, 0 }
  0xf6   : > { %v492_v10 = vmul.f32 %v1505_v2, %v1809_v27  ;;  %v587_v24 = vrot.slane %v1861_v48, 1  ;;  %v536_v32 = vsel %vm535_vm10, %v1804_v17, %v534_v19  ;;  %v578_v50 = vrot.slane %v1861_v48, 7  ;;  %vm573_vm10 = vmxor %vm1869_vm9, %vm1844_vm5 }
  0xf7   : > { %v486_v13 = vmul.f32 %v482_v8, %v482_v8  ;;  %1510 = vrsqrt.f32 %v1855_v12  ;;  %v1904_v46 = vsel %vm537_vm12, %v538_v34, %v536_v32  ;;  %v3195_v40 = vmov 0 }
  0xf8   : > { %v494_v6 = vsel %vm493_vm7, %v1809_v27, %v492_v10  ;;  %v559_v27 = vand.u32 2, %v1831_v57  ;;  %v591_v44 = vsel %vm3136_vm3, %v586_v16, %v587_v24  ;;  %v3196_v40 = vsel %vm1931_vm4, 4294967295, %v3195_v40 }
  0xf9   : > { %v1865_v20 = vsel %vm495_vm8, %v496_v11, %v494_v6  ;;  %v1507_v26 = vpop.eup %1506  ;;  %v1879_v30 = vadd.f32 %v486_v13, %v458_v59  ;;  %vm1937_vm6 = vcmp.ne.s32.totalorder %v566_v62, 0  ;;  %vm1941_vm7 = vcmp.ne.s32.totalorder %v567_v61, 0 }
  0xfa   : > { %v576_v28 = vrot.slane %v1865_v20, 7  ;;  %v520_v31 = vmul.f32 %v1507_v26, %v1816_v45  ;;  %v3198_v52 = vsel %vm1937_vm6, 4294967295, %v3197_v52  ;;  %v3199_v53 = vmov 0 }
  0xfb   : > { %1512 = vrsqrt.f32 %v1879_v30  ;;  %v3200_v53 = vsel %vm1941_vm7, 4294967295, %v3199_v53  ;;  %vm1951_vm8 = vcmp.eq.s32.totalorder %v559_v27, 0  ;;  %v3201_v60 = vmov 0 }
  0xfc   : > { %v583_v33 = vsel %vm3135_vm2, %v576_v28, %v577_v14  ;;  %v522_v39 = vsel %vm521_vm11, %v1816_v45, %v520_v31  ;;  %v3202_v60 = vsel %vm1951_vm8, 4294967295, %v3201_v60  ;;  %v642_v1 = vand.u32 4, %v1819_v49 }
  0xfd   : > { %v1509_v38 = vpop.eup %1508  ;;  %v1906_v36 = vsel %vm523_vm13, %v524_v42, %v522_v39  ;;  %v595_v17 = vsel %vm1844_vm5, %v583_v33, %v591_v44  ;;  %v643_v2 = vand.u32 4, %v1807_v21  ;;  %v585_v3 = vrot.slane %v1865_v20, 1 }
  0xfe   : > { %v527_v43 = vmul.f32 %v1509_v38, %v1827_v54  ;;  %v610_v55 = vrot.slane %v1906_v36, 7  ;;  %v599_v63 = vmin.f32 %v1859_v15, %v595_v17  ;;  %v603_v0 = vmax.f32 %v1859_v15, %v595_v17 }
  0xff   : > { %v644_v8 = vand.u32 4, %v1821_v35  ;;  %v582_v9 = vsel %vm3135_vm2, %v577_v14, %v578_v50  ;;  %v612_v10 = vrot.slane %v1904_v46, 7  ;;  %vm514_vm11 = vcmp.eq.f32.partialorder %v1855_v12, inf }
 0x100   : > { %v529_v45 = vsel %vm528_vm14, %v1827_v54, %v527_v43  ;;  %v620_v54 = vrot.slane %v1904_v46, 1  ;;  %v517_v61 = vand.u32 2147483648, %v1855_v12  ;;  %v1992_v26 = vsel %vm573_vm10, %v599_v63, %v603_v0 }
 0x101   : > { %v1915_v18 = vsel %vm530_vm15, %v531_v37, %v529_v45  ;;  %v1511_v62 = vpop.eup %1510  ;;  %vm516_vm14 = vcmp.eq.f32.partialorder %v1855_v12, 0.0  ;;  %v592_v32 = vsel %vm3136_vm3, %v585_v3, %v586_v16  ;;  %vm542_vm15 = vcmp.eq.f32.partialorder %v1879_v30, inf }
 0x102   : > { %v611_v59 = vrot.slane %v1915_v18, 7  ;;  %v619_v58 = vrot.slane %v1915_v18, 1  ;;  %v513_v13 = vmul.f32 %v1511_v62, %v1855_v12  ;;  %v618_v38 = vrot.slane %v1906_v36, 1 }
 0x103   : > { %vm2006_vm12 = vcmp.ne.s32.totalorder %v556_v25, 0  ;;  %v3203_v33 = vmov 0  ;;  %v545_v42 = vand.u32 2147483648, %v1879_v30  ;;  %v3205_v16 = vmov 0 }
 0x104   : > { %v616_v4 = vsel %vm3135_vm2, %v610_v55, %v611_v59  ;;  %v623_v7 = vsel %vm3136_vm3, %v619_v58, %v620_v54  ;;  %v515_v14 = vsel %vm514_vm11, %v1855_v12, %v513_v13  ;;  %v3204_v33 = vsel %vm2006_vm12, 4294967295, %v3203_v33 }
 0x105   : > { %v627_v11 = vsel %vm1844_vm5, %v616_v4, %v623_v7  ;;  %v1513_v15 = vpop.eup %1512  ;;  %v518_v34 = vsel %vm516_vm14, %v517_v61, %v515_v14  ;;  %vm2013_vm11 = vcmp.ne.s32.totalorder %v557_v56, 0  ;;  %v659_v25 = vrot.slane %v1992_v26, 6  ;;  %vm3222_vm5 = vmxor %vm1919_vm0, %vm1931_vm4 }
 0x106   : > { %v631_v19 = vmin.f32 %v1915_v18, %v627_v11  ;;  %v635_v6 = vmax.f32 %v1915_v18, %v627_v11  ;;  %v541_v31 = vmul.f32 %v1513_v15, %v1879_v30  ;;  %v579_v39 = vrot.slane %v518_v34, 7 }
 0x107   : > { %v588_v12 = vrot.slane %v518_v34, 1  ;;  %v3206_v16 = vsel %vm2013_vm11, 4294967295, %v3205_v16  ;;  %v668_v44 = vrot.slane %v1992_v26, 2  ;;  %vm2028_vm14 = vcmp.eq.s32.totalorder %v645_v47, 0 }
 0x108   : > { %v2022_v43 = vsel %vm573_vm10, %v631_v19, %v635_v6  ;;  %vm2034_vm13 = vcmp.ne.s32.totalorder %v559_v27, 0  ;;  %v3209_v56 = vmov 0  ;;  %v543_v22 = vsel %vm542_vm15, %v1879_v30, %v541_v31 }
 0x109   : > { %v3210_v56 = vsel %vm2034_vm13, 4294967295, %v3209_v56  ;;  %vm3211_vm10 = vcmp.lt.s32.totalorder %v1783_v23, 1  ;;  %v590_v27 = vsel %vm3136_vm3, %v587_v24, %v588_v12  ;;  %v593_v62 = vsel %vm3136_vm3, %v588_v12, %v585_v3 }
 0x10a   : > { %v581_v17 = vsel %vm3211_vm10, %v578_v50, %v579_v39  ;;  %vm3212_vm2 = vmmov %vm3211_vm10  ;;  %v596_v63 = vsel %vm1937_vm6, %v582_v9, %v590_v27  ;;  %vm2071_vm10 = vcmp.eq.s32.totalorder %v642_v1, 0  ;;  %vm2077_vm15 = vcmp.ne.s32.totalorder %v558_v29, 0 }
 0x10b   : > { %v584_v45 = vsel %vm3212_vm2, %v579_v39, %v576_v28  ;;  %v597_v28 = vsel %vm1941_vm7, %v581_v17, %v593_v62  ;;  %vm3213_vm2 = vcmp.eq.f32.partialorder %v1879_v30, 0.0  ;;  %v3216_v3 = vmov 0 }
 0x10c   : > { %v594_v50 = vsel %vm1931_vm4, %v584_v45, %v592_v32  ;;  %v2067_v24 = vsel %vm3213_vm2, %v545_v42, %v543_v22  ;;  %v3217_v3 = vsel %vm2077_vm15, 4294967295, %v3216_v3  ;;  %v600_v4 = vmin.f32 %v1861_v48, %v596_v63 }
 0x10d   : > { %v598_v30 = vmin.f32 %v1865_v20, %v594_v50  ;;  %v601_v7 = vmin.f32 %v518_v34, %v597_v28  ;;  %v602_v9 = vmax.f32 %v1865_v20, %v594_v50  ;;  %vm2090_vm2 = vcmp.eq.s32.totalorder %v643_v2, 0 }
 0x10e   : > { %v3218_v11 = vmov 0  ;;  %vm3220_vm3 = vcmp.lt.s32.totalorder %v1783_v23, 1  ;;  %v604_v13 = vmax.f32 %v1861_v48, %v596_v63  ;;  %v605_v15 = vmax.f32 %v518_v34, %v597_v28 }
 0x10f   : > { %v3219_v11 = vsel %vm2090_vm2, 4294967295, %v3218_v11  ;;  %v615_v29 = vsel %vm3220_vm3, %v611_v59, %v612_v10  ;;  %v613_v19 = vrot.slane %v2067_v24, 7  ;;  %vm3221_vm9 = vcmp.lt.s32.totalorder %v1783_v23, 7  ;;  %vm3223_vm3 = vmxor %vm1925_vm1, %vm1937_vm6 }
 0x110   : > { %v624_v20 = vsel %vm3221_vm9, %v618_v38, %v619_v58  ;;  %v693_v6 = vrot.slane %v2022_v43, 6  ;;  %v606_v59 = vsel %vm3222_vm5, %v598_v30, %v602_v9  ;;  %v621_v48 = vrot.slane %v2067_v24, 1  ;;  %vm3224_vm9 = vmxor %vm1951_vm8, %vm1941_vm7 }
 0x111   : > { %v2120_v18 = vsel %vm3223_vm3, %v600_v4, %v604_v13  ;;  %v609_v58 = vsel %vm3224_vm9, %v601_v7, %v605_v15  ;;  %v658_v61 = vrot.slane %v606_v59, 6  ;;  %v667_v14 = vrot.slane %v606_v59, 2 }
 0x112   : > { %vm2129_vm5 = vcmp.eq.s32.totalorder %v644_v8, 0  ;;  %v3225_v31 = vmov 0  ;;  %v660_v32 = vrot.slane %v2120_v18, 6  ;;  %v661_v34 = vrot.slane %v609_v58, 6 }
 0x113   : > { %v3226_v31 = vsel %vm2129_vm5, 4294967295, %v3225_v31  ;;  %v669_v39 = vrot.slane %v2120_v18, 2  ;;  %v670_v12 = vrot.slane %v609_v58, 2  ;;  %vm3227_vm3 = vcmp.lt.s32.totalorder %v1783_v23, 2 }
 0x114   : > { %v665_v42 = vsel %vm3227_vm3, %v658_v61, %v659_v25  ;;  %vm3228_vm8 = vcmp.lt.s32.totalorder %v1783_v23, 6  ;;  %vm3229_vm9 = vcmp.lt.s32.totalorder %v1783_v23, 1  ;;  %vm3231_vm5 = vmmov %vm3227_vm3  ;;  %v3274_v49 = vmov 0 }
 0x115   : > { %v674_v22 = vsel %vm3228_vm8, %v667_v14, %v668_v44  ;;  %v614_v17 = vsel %vm3229_vm9, %v612_v10, %v613_v19  ;;  %vm3230_vm1 = vmmov %vm3229_vm9  ;;  %v663_v27 = vsel %vm3231_vm5, %v660_v32, %v661_v34  ;;  %v672_v63 = vsel %vm3228_vm8, %v669_v39, %v670_v12 }
 0x116   : > { %v617_v45 = vsel %vm3230_vm1, %v613_v19, %v610_v55  ;;  %vm3232_vm0 = vmmov %vm3227_vm3  ;;  %vm3236_vm1 = vcmp.lt.s32.totalorder %v1783_v23, 7 }
 0x117   : > { %v664_v62 = vsel %vm3232_vm0, %v659_v25, %v660_v32  ;;  %vm3233_vm3 = vmmov %vm3232_vm0  ;;  %v622_v25 = vsel %vm3236_vm1, %v620_v54, %v621_v48 }
 0x118   : > { %v666_v50 = vsel %vm3233_vm3, %v661_v34, %v658_v61  ;;  %vm3234_vm2 = vmmov %vm3228_vm8  ;;  %v626_v61 = vsel %vm1931_vm4, %v617_v45, %v624_v20  ;;  %vm3238_vm3 = vnez %v3219_v11 }
 0x119   : > { %v673_v10 = vsel %vm3234_vm2, %v668_v44, %v669_v39  ;;  %vm3235_vm9 = vmmov %vm3234_vm2  ;;  %v676_v55 = vsel %vm2006_vm12, %v666_v50, %v674_v22  ;;  %v634_v34 = vmax.f32 %v1906_v36, %v626_v61 }
 0x11a   : > { %v675_v28 = vsel %vm3235_vm9, %v670_v12, %v667_v14  ;;  %vm3144_vm0 = vmxor %vm2028_vm14, %vm2034_vm13  ;;  %v677_v30 = vsel %vm2013_vm11, %v665_v42, %v673_v10  ;;  %v680_v4 = vmin.f32 %v606_v59, %v676_v55  ;;  %v684_v7 = vmax.f32 %v606_v59, %v676_v55 }
 0x11b   : > { %v679_v44 = vsel %vm2034_vm13, %v663_v27, %v675_v28  ;;  %v681_v9 = vmin.f32 %v1992_v26, %v677_v30  ;;  %v685_v15 = vmax.f32 %v1992_v26, %v677_v30  ;;  %vm3237_vm2 = vmmov %vm3236_vm1  ;;  %v628_v14 = vsel %vm1937_vm6, %v615_v29, %v622_v25 }
 0x11c   : > { %v683_v13 = vmin.f32 %v609_v58, %v679_v44  ;;  %v687_v19 = vmax.f32 %v609_v58, %v679_v44  ;;  %v625_v54 = vsel %vm3237_vm2, %v621_v48, %v618_v38  ;;  %vm3148_vm5 = vmxor %vm2071_vm10, %vm2006_vm12  ;;  %v678_v26 = vsel %vm2077_vm15, %v664_v62, %v672_v63 }
 0x11d   : > { %v629_v20 = vsel %vm1941_vm7, %v614_v17, %v625_v54  ;;  %v630_v29 = vmin.f32 %v1906_v36, %v626_v61  ;;  %v632_v59 = vmin.f32 %v1904_v46, %v628_v14  ;;  %vm3147_vm8 = vmxor %vm3238_vm3, %vm2013_vm11  ;;  %v701_v48 = vrot.slane %v2022_v43, 2 }
 0x11e   : > { %v2194_v38 = vsel %vm3144_vm0, %v683_v13, %v687_v19  ;;  %v633_v32 = vmin.f32 %v2067_v24, %v629_v20  ;;  %v636_v39 = vmax.f32 %v1904_v46, %v628_v14  ;;  %v637_v12 = vmax.f32 %v2067_v24, %v629_v20 }
 0x11f   : > { %v731_v58 = vrot.slane %v2194_v38, 7  ;;  %v682_v42 = vmin.f32 %v2120_v18, %v678_v26  ;;  %v686_v22 = vmax.f32 %v2120_v18, %v678_v26  ;;  %v739_v17 = vrot.slane %v2194_v38, 1 }
 0x120   : > { %vm3239_vm9 = vnez %v3192_v41  ;;  %vm3241_vm2 = vnez %v3226_v31  ;;  %v2227_v46 = vsel %vm3148_vm5, %v680_v4, %v684_v7  ;;  %v2234_v36 = vsel %vm3147_vm8, %v681_v9, %v685_v15 }
 0x121   : > { %vm3240_vm1 = vmxor %vm3239_vm9, %vm1931_vm4  ;;  %vm3242_vm9 = vnez %v3194_v51  ;;  %vm3244_vm0 = vnez %v3202_v60  ;;  %vm3246_vm8 = vcmp.lt.s32.totalorder %v1783_v23, 2  ;;  %v728_v55 = vrot.slane %v2227_v46, 7 }
 0x122   : > { %v638_v45 = vsel %vm3240_vm1, %v630_v29, %v634_v34  ;;  %vm3243_vm1 = vmxor %vm3242_vm9, %vm1937_vm6  ;;  %vm3247_vm9 = vcmp.lt.s32.totalorder %v1783_v23, 6  ;;  %v729_v34 = vrot.slane %v2234_v36, 7 }
 0x123   : > { %v640_v41 = vsel %vm3243_vm1, %v632_v59, %v636_v39  ;;  %vm3245_vm4 = vmxor %vm3244_vm0, %vm1941_vm7  ;;  %v692_v18 = vrot.slane %v638_v45, 6  ;;  %v700_v27 = vrot.slane %v638_v45, 2 }
 0x124   : > { %v641_v24 = vsel %vm3245_vm4, %v633_v32, %v637_v12  ;;  %v694_v62 = vrot.slane %v640_v41, 6  ;;  %v702_v63 = vrot.slane %v640_v41, 2  ;;  %vm3248_vm0 = vmxor %vm3241_vm2, %vm2077_vm15 }
 0x125   : > { %v695_v50 = vrot.slane %v641_v24, 6  ;;  %v703_v10 = vrot.slane %v641_v24, 2  ;;  %v698_v51 = vsel %vm3246_vm8, %v692_v18, %v693_v6  ;;  %v706_v28 = vsel %vm3247_vm9, %v700_v27, %v701_v48  ;;  %vm3249_vm4 = vmmov %vm3246_vm8 }
 0x126   : > { %v2257_v60 = vsel %vm3248_vm0, %v682_v42, %v686_v22  ;;  %vm3250_vm1 = vmmov %vm3249_vm4 }
 0x127   : > { %v696_v25 = vsel %vm3249_vm4, %v694_v62, %v695_v50  ;;  %v697_v30 = vsel %vm3250_vm1, %v693_v6, %v694_v62  ;;  %vm3251_vm8 = vmmov %vm3250_vm1  ;;  %v704_v4 = vsel %vm3247_vm9, %v702_v63, %v703_v10  ;;  %v730_v12 = vrot.slane %v2257_v60, 7 }
 0x128   : > { %v699_v44 = vsel %vm3251_vm8, %v695_v50, %v692_v18  ;;  %vm3252_vm5 = vmmov %vm3247_vm9  ;;  %v710_v15 = vsel %vm2077_vm15, %v697_v30, %v704_v4  ;;  %vm3257_vm8 = vcmp.lt.s32.totalorder %v1783_v23, 1  ;;  %v736_v62 = vrot.slane %v2227_v46, 1 }
 0x129   : > { %v705_v7 = vsel %vm3252_vm5, %v701_v48, %v702_v63  ;;  %vm3253_vm0 = vmmov %vm3252_vm5  ;;  %v708_v13 = vsel %vm2006_vm12, %v699_v44, %v706_v28  ;;  %v714_v59 = vmin.f32 %v640_v41, %v710_v15  ;;  %v718_v48 = vmax.f32 %v640_v41, %v710_v15 }
 0x12a   : > { %v707_v9 = vsel %vm3253_vm0, %v703_v10, %v700_v27  ;;  %v709_v6 = vsel %vm2013_vm11, %v698_v51, %v705_v7  ;;  %v712_v54 = vmin.f32 %v638_v45, %v708_v13  ;;  %v716_v61 = vmax.f32 %v638_v45, %v708_v13  ;;  %vm3254_vm5 = vmxor %vm2071_vm10, %vm2006_vm12 }
 0x12b   : > { %v711_v19 = vsel %vm2034_vm13, %v696_v25, %v707_v9  ;;  %v713_v14 = vmin.f32 %v2022_v43, %v709_v6  ;;  %v717_v20 = vmax.f32 %v2022_v43, %v709_v6  ;;  %vm3255_vm4 = vmxor %vm2028_vm14, %vm2034_vm13  ;;  %v735_v42 = vsel %vm3257_vm8, %v731_v58, %v728_v55 }
 0x12c   : > { %v715_v26 = vmin.f32 %v641_v24, %v711_v19  ;;  %v719_v29 = vmax.f32 %v641_v24, %v711_v19  ;;  %v2289_v32 = vsel %vm3254_vm5, %v712_v54, %v716_v61  ;;  %vm3256_vm1 = vmxor %vm3238_vm3, %vm2013_vm11  ;;  %v737_v50 = vrot.slane %v2234_v36, 1 }
 0x12d   : > { %v2304_v43 = vsel %vm3256_vm1, %v713_v14, %v717_v20  ;;  %vm3258_vm9 = vmxor %vm3241_vm2, %vm2077_vm15  ;;  %v738_v63 = vrot.slane %v2257_v60, 1  ;;  %v760_v10 = vrot.slane %v2289_v32, 7  ;;  %v768_v25 = vrot.slane %v2289_v32, 1 }
 0x12e   : > { %v2297_v39 = vsel %vm3255_vm4, %v715_v26, %v719_v29  ;;  %v2316_v41 = vsel %vm3258_vm9, %v714_v59, %v718_v48  ;;  %vm3259_vm0 = vmmov %vm3257_vm8  ;;  %v761_v51 = vrot.slane %v2304_v43, 7  ;;  %vm3262_vm8 = vcmp.lt.s32.totalorder %v1783_v23, 7 }
 0x12f   : > { %v763_v22 = vrot.slane %v2297_v39, 7  ;;  %v771_v45 = vrot.slane %v2297_v39, 1  ;;  %v734_v24 = vsel %vm3259_vm0, %v728_v55, %v729_v34  ;;  %vm3260_vm5 = vmmov %vm3259_vm0  ;;  %v762_v28 = vrot.slane %v2316_v41, 7 }
 0x130   : > { %v732_v18 = vsel %vm3260_vm5, %v730_v12, %v731_v58  ;;  %vm3261_vm4 = vmmov %vm3259_vm0  ;;  %v742_v58 = vsel %vm3262_vm8, %v736_v62, %v737_v50  ;;  %v769_v30 = vrot.slane %v2304_v43, 1  ;;  %vm3264_vm0 = vnez %v3196_v40 }
 0x131   : > { %v733_v27 = vsel %vm3261_vm4, %v729_v34, %v730_v12  ;;  %vm3263_vm9 = vmmov %vm3262_vm8  ;;  %v744_v7 = vsel %vm3264_vm0, %v735_v42, %v742_v58  ;;  %v3272_v29 = vmov 0  ;;  %vm2391_vm13 = vcmp.ne.s32.totalorder %v645_v47, 0 }
 0x132   : > { %v743_v55 = vsel %vm3263_vm9, %v739_v17, %v736_v62  ;;  %vm3265_vm4 = vmmov %vm3262_vm8  ;;  %vm3267_vm9 = vnez %v3188_v5  ;;  %v748_v15 = vmin.f32 %v2227_v46, %v744_v7  ;;  %v752_v61 = vmax.f32 %v2227_v46, %v744_v7 }
 0x133   : > { %v740_v44 = vsel %vm3265_vm4, %v738_v63, %v739_v17  ;;  %vm3266_vm1 = vmmov %vm3265_vm4  ;;  %v747_v9 = vsel %vm1941_vm7, %v732_v18, %v743_v55  ;;  %vm2373_vm4 = vcmp.ne.s32.totalorder %v642_v1, 0  ;;  %vm2379_vm8 = vcmp.ne.s32.totalorder %v643_v2, 0 }
 0x134   : > { %v741_v4 = vsel %vm3266_vm1, %v737_v50, %v738_v63  ;;  %v746_v17 = vsel %vm1937_vm6, %v733_v27, %v740_v44  ;;  %v751_v6 = vmin.f32 %v2194_v38, %v747_v9  ;;  %vm2385_vm1 = vcmp.ne.s32.totalorder %v644_v8, 0  ;;  %vm3276_vm15 = vmmov %vm3260_vm5 }
 0x135   : > { %v745_v13 = vsel %vm3267_vm9, %v734_v24, %v741_v4  ;;  %v750_v54 = vmin.f32 %v2257_v60, %v746_v17  ;;  %v3273_v29 = vsel %vm2385_vm1, 4294967295, %v3272_v29  ;;  %v3275_v49 = vsel %vm2391_vm13, 4294967295, %v3274_v49  ;;  %vm3277_vm11 = vmxor %vm2071_vm10, %vm3264_vm0 }
 0x136   : > { %v749_v19 = vmin.f32 %v2234_v36, %v745_v13  ;;  %v753_v14 = vmax.f32 %v2234_v36, %v745_v13  ;;  %v754_v1 = vmax.f32 %v2257_v60, %v746_v17  ;;  %v755_v21 = vmax.f32 %v2194_v38, %v747_v9  ;;  %vm3278_vm12 = vmxor %vm3238_vm3, %vm3267_vm9 }
 0x137   : > { %v764_v2 = vsel %vm3260_vm5, %v762_v28, %v763_v22  ;;  %v765_v35 = vsel %vm3276_vm15, %v761_v51, %v762_v28  ;;  %v756_v57 = vsel %vm3277_vm11, %v748_v15, %v752_v61  ;;  %vm3279_vm13 = vmmov %vm3260_vm5  ;;  %v767_v38 = vsel %vm3260_vm5, %v763_v22, %v760_v10 }
 0x138   : > { %v757_v47 = vsel %vm3278_vm12, %v749_v19, %v753_v14  ;;  %v766_v8 = vsel %vm3279_vm13, %v760_v10, %v761_v51  ;;  %vm3280_vm15 = vmxor %vm3241_vm2, %vm1937_vm6  ;;  %v770_v60 = vrot.slane %v2316_v41, 1  ;;  %vm3282_vm12 = vcmp.lt.s32.totalorder %v1783_v23, 7 }
 0x139   : > { %v758_v46 = vsel %vm3280_vm15, %v750_v54, %v754_v1  ;;  %vm3281_vm11 = vmxor %vm2028_vm14, %vm1941_vm7  ;;  %v774_v59 = vsel %vm3282_vm12, %v768_v25, %v769_v30  ;;  %v808_v12 = vrot.slane %v756_v57, 4  ;;  %v809_v42 = vrot.slane %v757_v47, 4 }
 0x13a   : > { %v759_v36 = vsel %vm3281_vm11, %v751_v6, %v755_v21  ;;  %vm3283_vm13 = vmmov %vm3282_vm12  ;;  %v776_v34 = vsel %vm3264_vm0, %v767_v38, %v774_v59  ;;  %v3294_v7 = vmov 0  ;;  %v3297_v15 = vmov 0 }
 0x13b   : > { %v775_v48 = vsel %vm3283_vm13, %v771_v45, %v768_v25  ;;  %vm3284_vm5 = vmmov %vm3282_vm12  ;;  %v780_v27 = vmin.f32 %v2289_v32, %v776_v34  ;;  %v784_v10 = vmax.f32 %v2289_v32, %v776_v34  ;;  %v811_v44 = vrot.slane %v759_v36, 4 }
 0x13c   : > { %v772_v22 = vsel %vm3284_vm5, %v770_v60, %v771_v45  ;;  %vm3285_vm15 = vmmov %vm3284_vm5  ;;  %v779_v18 = vsel %vm1941_vm7, %v764_v2, %v775_v48  ;;  %vm3289_vm5 = vcmp.lt.s32.totalorder %v1783_v23, 4 }
 0x13d   : > { %v773_v24 = vsel %vm3285_vm15, %v769_v30, %v770_v60  ;;  %v778_v50 = vsel %vm1937_vm6, %v765_v35, %v772_v22  ;;  %v783_v63 = vmin.f32 %v2297_v39, %v779_v18  ;;  %v787_v55 = vmax.f32 %v2297_v39, %v779_v18  ;;  %vm3286_vm11 = vmxor %vm2071_vm10, %vm3264_vm0 }
 0x13e   : > { %v777_v62 = vsel %vm3267_vm9, %v766_v8, %v773_v24  ;;  %v782_v51 = vmin.f32 %v2316_v41, %v778_v50  ;;  %v786_v58 = vmax.f32 %v2316_v41, %v778_v50  ;;  %v788_v25 = vsel %vm3286_vm11, %v780_v27, %v784_v10  ;;  %vm3287_vm12 = vmxor %vm3238_vm3, %vm3267_vm9 }
 0x13f   : > { %v781_v45 = vmin.f32 %v2304_v43, %v777_v62  ;;  %v785_v28 = vmax.f32 %v2304_v43, %v777_v62  ;;  %v810_v30 = vrot.slane %v758_v46, 4  ;;  %vm3288_vm13 = vmxor %vm3241_vm2, %vm1937_vm6  ;;  %v815_v0 = vsel %vm3289_vm5, %v808_v12, %v809_v42 }
 0x140   : > { %v790_v39 = vsel %vm3288_vm13, %v782_v51, %v786_v58  ;;  %v833_v43 = vrot.slane %v788_v25, 4  ;;  %vm3290_vm10 = vmxor %vm2028_vm14, %vm1941_vm7  ;;  %vm3160_vm2 = vmmov 1   ;;  %vm3296_vm14 = vnez %v3275_v49 }
 0x141   : > { %v789_v32 = vsel %vm3287_vm12, %v781_v45, %v785_v28  ;;  %v791_v11 = vsel %vm3290_vm10, %v783_v63, %v787_v55  ;;  %vm3291_vm15 = vmmov %vm3289_vm5  ;;  %v835_v8 = vrot.slane %v790_v39, 4 }
 0x142   : > { %v813_v41 = vsel %vm3291_vm15, %v810_v30, %v811_v44  ;;  %vm3292_vm3 = vmmov %vm3289_vm5  ;;  %v834_v35 = vrot.slane %v789_v32, 4  ;;  %v836_v38 = vrot.slane %v791_v11, 4 }
 0x143   : > { %v814_v31 = vsel %vm3292_vm3, %v809_v42, %v810_v30  ;;  %vm3293_vm11 = vmmov %vm3292_vm3 }
 0x144   : > { %v816_v4 = vsel %vm3293_vm11, %v811_v44, %v808_v12  ;;  %vm2481_vm12 = vmxor %vm3160_vm2, %vm2373_vm4  ;;  %v818_v9 = vsel %vm2379_vm8, %v815_v0, %v814_v31  ;;  %v819_v13 = vsel %vm2385_vm1, %v814_v31, %v813_v41  ;;  %v840_v34 = vsel %vm3292_vm3, %v836_v38, %v833_v43 }
 0x145   : > { %v3295_v7 = vsel %vm2481_vm12, 4294967295, %v3294_v7  ;;  %v817_v37 = vsel %vm2373_vm4, %v816_v4, %v815_v0  ;;  %v820_v17 = vsel %vm3296_vm14, %v813_v41, %v816_v4  ;;  %vm2496_vm13 = vmxor %vm3160_vm2, %vm2385_vm1  ;;  %v822_v19 = vmin.f32 %v757_v47, %v818_v9 }
 0x146   : > { %v3298_v15 = vsel %vm2496_vm13, 4294967295, %v3297_v15  ;;  %v821_v6 = vmin.f32 %v756_v57, %v817_v37  ;;  %v823_v54 = vmin.f32 %v758_v46, %v819_v13  ;;  %v824_v61 = vmin.f32 %v759_v36, %v820_v17  ;;  %vm3299_vm5 = vmmov %vm3292_vm3 }
 0x147   : > { %v825_v14 = vmax.f32 %v756_v57, %v817_v37  ;;  %v826_v1 = vmax.f32 %v757_v47, %v818_v9  ;;  %v827_v21 = vmax.f32 %v758_v46, %v819_v13  ;;  %v828_v2 = vmax.f32 %v759_v36, %v820_v17  ;;  %vm3300_vm10 = vmmov %vm3292_vm3 }
 0x148   : > { %v837_v47 = vsel %vm3299_vm5, %v835_v8, %v836_v38  ;;  %v838_v46 = vsel %vm3300_vm10, %v834_v35, %v835_v8  ;;  %vm3301_vm15 = vmmov %vm3292_vm3  ;;  %vm3302_vm11 = vcmp.lt.s32.totalorder %v1783_v23, 2  ;;  %vm3306_vm3 = vcmp.lt.s32.totalorder %v1783_v23, 6 }
 0x149   : > { %v2502_v60 = vsel %vm2481_vm12, %v821_v6, %v825_v14  ;;  %v2506_v59 = vsel %vm2379_vm8, %v822_v19, %v826_v1  ;;  %v2510_v48 = vsel %vm2496_vm13, %v823_v54, %v827_v21  ;;  %v2514_v57 = vsel %vm3296_vm14, %v824_v61, %v828_v2  ;;  %vm3303_vm5 = vmmov %vm3302_vm11 }
 0x14a   : > { %v839_v36 = vsel %vm3301_vm15, %v833_v43, %v834_v35  ;;  %v843_v22 = vsel %vm2385_vm1, %v838_v46, %v837_v47  ;;  %v844_v24 = vsel %vm3296_vm14, %v837_v47, %v840_v34  ;;  %v861_v28 = vrot.slane %v2502_v60, 6  ;;  %vm3304_vm10 = vmmov %vm3303_vm5 }
 0x14b   : > { %v841_v12 = vsel %vm2373_vm4, %v840_v34, %v839_v36  ;;  %v842_v42 = vsel %vm2379_vm8, %v839_v36, %v838_v46  ;;  %v847_v62 = vmin.f32 %v790_v39, %v843_v22  ;;  %v848_v50 = vmin.f32 %v791_v11, %v844_v24  ;;  %vm3305_vm15 = vmmov %vm3303_vm5 }
 0x14c   : > { %v845_v18 = vmin.f32 %v788_v25, %v841_v12  ;;  %v846_v27 = vmin.f32 %v789_v32, %v842_v42  ;;  %v849_v63 = vmax.f32 %v788_v25, %v841_v12  ;;  %v850_v10 = vmax.f32 %v789_v32, %v842_v42 }
 0x14d   : > { %v851_v45 = vmax.f32 %v790_v39, %v843_v22  ;;  %v852_v51 = vmax.f32 %v791_v11, %v844_v24  ;;  %v862_v58 = vrot.slane %v2506_v59, 6  ;;  %v863_v55 = vrot.slane %v2510_v48, 6 }
 0x14e   : > { %v864_v30 = vrot.slane %v2514_v57, 6  ;;  %v2538_v44 = vsel %vm2481_vm12, %v845_v18, %v849_v63  ;;  %v2542_v0 = vsel %vm2379_vm8, %v846_v27, %v850_v10  ;;  %v869_v31 = vrot.slane %v2502_v60, 2 }
 0x14f   : > { %v2546_v25 = vsel %vm2496_vm13, %v847_v62, %v851_v45  ;;  %v2550_v32 = vsel %vm3296_vm14, %v848_v50, %v852_v51  ;;  %v866_v43 = vsel %vm3303_vm5, %v862_v58, %v863_v55  ;;  %v867_v11 = vsel %vm3304_vm10, %v861_v28, %v862_v58  ;;  %vm3308_vm5 = vmmov %vm3306_vm3 }
 0x150   : > { %v865_v39 = vsel %vm3302_vm11, %v863_v55, %v864_v30  ;;  %v868_v41 = vsel %vm3305_vm15, %v864_v30, %v861_v28  ;;  %v870_v4 = vrot.slane %v2506_v59, 2  ;;  %v871_v37 = vrot.slane %v2510_v48, 2  ;;  %vm3307_vm11 = vmmov %vm3306_vm3 }
 0x151   : > { %v872_v9 = vrot.slane %v2514_v57, 2  ;;  %v893_v13 = vrot.slane %v2538_v44, 6  ;;  %v894_v17 = vrot.slane %v2542_v0, 6  ;;  %v895_v6 = vrot.slane %v2546_v25, 6  ;;  %vm3309_vm10 = vmmov %vm3306_vm3 }
 0x152   : > { %v896_v19 = vrot.slane %v2550_v32, 6  ;;  %v874_v61 = vsel %vm3307_vm11, %v870_v4, %v871_v37  ;;  %v875_v14 = vsel %vm3308_vm5, %v869_v31, %v870_v4  ;;  %vm3310_vm15 = vnez %v3204_v33 }
 0x153   : > { %v873_v54 = vsel %vm3306_vm3, %v871_v37, %v872_v9  ;;  %v876_v1 = vsel %vm3309_vm10, %v872_v9, %v869_v31  ;;  %vm2579_vm13 = vmxor %vm3160_vm2, %vm3310_vm15  ;;  %v3311_v21 = vmov 0  ;;  %v877_v2 = vsel %vm3310_vm15, %v868_v41, %v875_v14 }
 0x154   : > { %v3312_v21 = vsel %vm2579_vm13, 4294967295, %v3311_v21  ;;  %vm3313_vm3 = vnez %v3206_v16  ;;  %vm3314_vm11 = vnez %v3217_v3  ;;  %vm3315_vm5 = vnez %v3210_v56 }
 0x155   : > { %v878_v35 = vsel %vm3313_vm3, %v867_v11, %v874_v61  ;;  %v879_v8 = vsel %vm3314_vm11, %v866_v43, %v873_v54  ;;  %v880_v38 = vsel %vm3315_vm5, %v865_v39, %v876_v1  ;;  %vm2594_vm10 = vmxor %vm3160_vm2, %vm3314_vm11  ;;  %v3316_v47 = vmov 0 }
 0x156   : > { %v3317_v47 = vsel %vm2594_vm10, 4294967295, %v3316_v47  ;;  %v881_v46 = vmin.f32 %v2502_v60, %v877_v2  ;;  %v882_v36 = vmin.f32 %v2506_v59, %v878_v35  ;;  %v883_v34 = vmin.f32 %v2510_v48, %v879_v8 }
 0x157   : > { %v884_v12 = vmin.f32 %v2514_v57, %v880_v38  ;;  %v885_v42 = vmax.f32 %v2502_v60, %v877_v2  ;;  %v886_v22 = vmax.f32 %v2506_v59, %v878_v35  ;;  %v887_v24 = vmax.f32 %v2510_v48, %v879_v8 }
 0x158   : > { %v888_v18 = vmax.f32 %v2514_v57, %v880_v38  ;;  %vm3318_vm2 = vcmp.lt.s32.totalorder %v1783_v23, 2  ;;  %v901_v10 = vrot.slane %v2538_v44, 2  ;;  %v902_v45 = vrot.slane %v2542_v0, 2 }
 0x159   : > { %v897_v27 = vsel %vm3318_vm2, %v895_v6, %v896_v19  ;;  %vm3319_vm12 = vmmov %vm3318_vm2  ;;  %v2616_v60 = vsel %vm2579_vm13, %v881_v46, %v885_v42  ;;  %v2620_v59 = vsel %vm3313_vm3, %v882_v36, %v886_v22  ;;  %v2624_v48 = vsel %vm2594_vm10, %v883_v34, %v887_v24 }
 0x15a   : > { %v898_v62 = vsel %vm3319_vm12, %v894_v17, %v895_v6  ;;  %vm3320_vm14 = vmmov %vm3318_vm2  ;;  %v2628_v57 = vsel %vm3315_vm5, %v884_v12, %v888_v18  ;;  %v903_v51 = vrot.slane %v2546_v25, 2  ;;  %v904_v28 = vrot.slane %v2550_v32, 2 }
 0x15b   : > { %v899_v50 = vsel %vm3320_vm14, %v893_v13, %v894_v17  ;;  %vm3321_vm1 = vmmov %vm3318_vm2  ;;  %v929_v58 = vrot.slane %v2616_v60, 7  ;;  %v930_v55 = vrot.slane %v2620_v59, 7  ;;  %v931_v30 = vrot.slane %v2624_v48, 7 }
 0x15c   : > { %v900_v63 = vsel %vm3321_vm1, %v896_v19, %v893_v13  ;;  %v932_v39 = vrot.slane %v2628_v57, 7  ;;  %vm3322_vm1 = vcmp.lt.s32.totalorder %v1783_v23, 6  ;;  %v937_v36 = vrot.slane %v2616_v60, 1 }
 0x15d   : > { %v905_v43 = vsel %vm3322_vm1, %v903_v51, %v904_v28  ;;  %vm3323_vm2 = vmmov %vm3322_vm1  ;;  %v938_v34 = vrot.slane %v2620_v59, 1  ;;  %v939_v12 = vrot.slane %v2624_v48, 1  ;;  %v940_v42 = vrot.slane %v2628_v57, 1 }
 0x15e   : > { %v906_v11 = vsel %vm3323_vm2, %v902_v45, %v903_v51  ;;  %vm3324_vm12 = vmmov %vm3322_vm1  ;;  %v911_v9 = vsel %vm3314_vm11, %v898_v62, %v905_v43 }
 0x15f   : > { %v907_v41 = vsel %vm3324_vm12, %v901_v10, %v902_v45  ;;  %vm3325_vm14 = vmmov %vm3322_vm1  ;;  %v910_v37 = vsel %vm3313_vm3, %v899_v50, %v906_v11  ;;  %v915_v19 = vmin.f32 %v2546_v25, %v911_v9  ;;  %v919_v1 = vmax.f32 %v2546_v25, %v911_v9 }
 0x160   : > { %v908_v31 = vsel %vm3325_vm14, %v904_v28, %v901_v10  ;;  %v909_v4 = vsel %vm3310_vm15, %v900_v63, %v907_v41  ;;  %v914_v6 = vmin.f32 %v2542_v0, %v910_v37  ;;  %v918_v14 = vmax.f32 %v2542_v0, %v910_v37 }
 0x161   : > { %v912_v13 = vsel %vm3315_vm5, %v897_v27, %v908_v31  ;;  %v913_v17 = vmin.f32 %v2538_v44, %v909_v4  ;;  %v917_v61 = vmax.f32 %v2538_v44, %v909_v4  ;;  %vm3326_vm1 = vcmp.lt.s32.totalorder %v1783_v23, 1 }
 0x162   : > { %v916_v54 = vmin.f32 %v2550_v32, %v912_v13  ;;  %v920_v2 = vmax.f32 %v2550_v32, %v912_v13  ;;  %v933_v35 = vsel %vm3326_vm1, %v931_v30, %v932_v39  ;;  %vm3327_vm2 = vmmov %vm3326_vm1  ;;  %v2676_v0 = vsel %vm3313_vm3, %v914_v6, %v918_v14 }
 0x163   : > { %v934_v8 = vsel %vm3327_vm2, %v930_v55, %v931_v30  ;;  %vm3328_vm12 = vmmov %vm3326_vm1  ;;  %v2672_v44 = vsel %vm2579_vm13, %v913_v17, %v917_v61  ;;  %v2680_v25 = vsel %vm2594_vm10, %v915_v19, %v919_v1  ;;  %v962_v24 = vrot.slane %v2676_v0, 7 }
 0x164   : > { %v935_v38 = vsel %vm3328_vm12, %v929_v58, %v930_v55  ;;  %vm3329_vm14 = vmmov %vm3326_vm1  ;;  %v2684_v32 = vsel %vm3315_vm5, %v916_v54, %v920_v2  ;;  %v961_v22 = vrot.slane %v2672_v44, 7  ;;  %v963_v18 = vrot.slane %v2680_v25, 7 }
 0x165   : > { %v936_v46 = vsel %vm3329_vm14, %v932_v39, %v929_v58  ;;  %v964_v27 = vrot.slane %v2684_v32, 7  ;;  %vm3330_vm1 = vcmp.lt.s32.totalorder %v1783_v23, 7  ;;  %vm3334_vm10 = vmmov 1  }
 0x166   : > { %v941_v62 = vsel %vm3330_vm1, %v939_v12, %v940_v42  ;;  %vm3331_vm2 = vmmov %vm3330_vm1  ;;  %v3335_v45 = vmov 0  ;;  %v3337_v30 = vmov 0  ;;  %v969_v54 = vrot.slane %v2672_v44, 1 }
 0x167   : > { %v942_v50 = vsel %vm3331_vm2, %v938_v34, %v939_v12  ;;  %vm3332_vm12 = vmmov %vm3330_vm1  ;;  %v947_v58 = vsel %vm1937_vm6, %v934_v8, %v941_v62  ;;  %vm3339_vm2 = vcmp.lt.s32.totalorder %v1783_v23, 1  ;;  %v970_v61 = vrot.slane %v2676_v0, 1 }
 0x168   : > { %v943_v63 = vsel %vm3332_vm12, %v937_v36, %v938_v34  ;;  %vm3333_vm14 = vmmov %vm3330_vm1  ;;  %v946_v28 = vsel %vm3267_vm9, %v935_v38, %v942_v50  ;;  %v951_v11 = vmin.f32 %v2624_v48, %v947_v58  ;;  %v955_v37 = vmax.f32 %v2624_v48, %v947_v58 }
 0x169   : > { %v944_v10 = vsel %vm3333_vm14, %v940_v42, %v937_v36  ;;  %vm2705_vm13 = vmxor %vm3334_vm10, %vm3264_vm0  ;;  %v945_v51 = vsel %vm3264_vm0, %v936_v46, %v943_v63  ;;  %v950_v43 = vmin.f32 %v2620_v59, %v946_v28  ;;  %v954_v4 = vmax.f32 %v2620_v59, %v946_v28 }
 0x16a   : > { %v3336_v45 = vsel %vm2705_vm13, 4294967295, %v3335_v45  ;;  %v948_v55 = vsel %vm1941_vm7, %v933_v35, %v944_v10  ;;  %vm2720_vm1 = vmxor %vm3334_vm10, %vm1937_vm6  ;;  %v949_v39 = vmin.f32 %v2616_v60, %v945_v51  ;;  %v953_v31 = vmax.f32 %v2616_v60, %v945_v51 }
 0x16b   : > { %v3338_v30 = vsel %vm2720_vm1, 4294967295, %v3337_v30  ;;  %v952_v41 = vmin.f32 %v2628_v57, %v948_v55  ;;  %v956_v9 = vmax.f32 %v2628_v57, %v948_v55  ;;  %v965_v13 = vsel %vm3339_vm2, %v963_v18, %v964_v27  ;;  %vm3340_vm12 = vmmov %vm3339_vm2 }
 0x16c   : > { %v966_v17 = vsel %vm3340_vm12, %v962_v24, %v963_v18  ;;  %vm3341_vm14 = vmmov %vm3339_vm2  ;;  %v957_v60 = vsel %vm2705_vm13, %v949_v39, %v953_v31  ;;  %v958_v59 = vsel %vm3267_vm9, %v950_v43, %v954_v4  ;;  %v959_v48 = vsel %vm2720_vm1, %v951_v11, %v955_v37 }
 0x16d   : > { %v967_v6 = vsel %vm3341_vm14, %v961_v22, %v962_v24  ;;  %vm3342_vm5 = vmmov %vm3339_vm2  ;;  %v960_v57 = vsel %vm1941_vm7, %v952_v41, %v956_v9  ;;  %v971_v14 = vrot.slane %v2680_v25, 1  ;;  %v972_v1 = vrot.slane %v2684_v32, 1 }
 0x16e   : > { %v968_v19 = vsel %vm3342_vm5, %v964_v27, %v961_v22  ;;  %v1013_v2 = vmin.f32 %v957_v60, %v958_v59  ;;  %v1015_v35 = vmin.f32 %v959_v48, %v960_v57  ;;  %v1018_v8 = vmax.f32 %v958_v59, %v957_v60 }
 0x16f   : > { %v1020_v38 = vmax.f32 %v960_v57, %v959_v48  ;;  %vm3343_vm5 = vcmp.lt.s32.totalorder %v1783_v23, 7 }
 0x170   : > { %v973_v46 = vsel %vm3343_vm5, %v971_v14, %v972_v1  ;;  %vm3344_vm2 = vmmov %vm3343_vm5  ;;  %v1045_v55 = vrot.slane %v1013_v2, 4  ;;  %v1046_v39 = vrot.slane %v1018_v8, 4  ;;  %v1047_v43 = vrot.slane %v1015_v35, 4 }
 0x171   : > { %v974_v36 = vsel %vm3344_vm2, %v970_v61, %v971_v14  ;;  %vm3345_vm12 = vmmov %vm3344_vm2  ;;  %v979_v24 = vsel %vm1937_vm6, %v966_v17, %v973_v46  ;;  %v1048_v11 = vrot.slane %v1020_v38, 4  ;;  %vm3347_vm5 = vcmp.lt.s32.totalorder %v1783_v23, 4 }
 0x172   : > { %v975_v34 = vsel %vm3345_vm12, %v969_v54, %v970_v61  ;;  %vm3346_vm14 = vmmov %vm3344_vm2  ;;  %v978_v22 = vsel %vm3267_vm9, %v967_v6, %v974_v36  ;;  %v983_v50 = vmin.f32 %v2680_v25, %v979_v24  ;;  %v987_v28 = vmax.f32 %v2680_v25, %v979_v24 }
 0x173   : > { %v976_v12 = vsel %vm3346_vm14, %v972_v1, %v969_v54  ;;  %v977_v42 = vsel %vm3264_vm0, %v968_v19, %v975_v34  ;;  %v982_v62 = vmin.f32 %v2676_v0, %v978_v22  ;;  %v986_v51 = vmax.f32 %v2676_v0, %v978_v22  ;;  %vm3348_vm2 = vmmov %vm3347_vm5 }
 0x174   : > { %v980_v18 = vsel %vm1941_vm7, %v965_v13, %v976_v12  ;;  %v981_v27 = vmin.f32 %v2672_v44, %v977_v42  ;;  %v985_v10 = vmax.f32 %v2672_v44, %v977_v42  ;;  %v991_v4 = vsel %vm2720_vm1, %v983_v50, %v987_v28  ;;  %vm3349_vm12 = vmmov %vm3348_vm2 }
 0x175   : > { %v984_v63 = vmin.f32 %v2684_v32, %v980_v18  ;;  %v988_v58 = vmax.f32 %v2684_v32, %v980_v18  ;;  %v990_v31 = vsel %vm3267_vm9, %v982_v62, %v986_v51  ;;  %v1049_v9 = vsel %vm3347_vm5, %v1047_v43, %v1048_v11  ;;  %vm3350_vm14 = vmmov %vm3348_vm2 }
 0x176   : > { %v989_v41 = vsel %vm2705_vm13, %v981_v27, %v985_v10  ;;  %v1050_v13 = vsel %vm3348_vm2, %v1046_v39, %v1047_v43  ;;  %v1051_v17 = vsel %vm3349_vm12, %v1045_v55, %v1046_v39  ;;  %v1052_v6 = vsel %vm3350_vm14, %v1048_v11, %v1045_v55  ;;  %vm2795_vm1 = vmxor %vm3334_vm10, %vm2379_vm8 }
 0x177   : > { %v992_v44 = vsel %vm1941_vm7, %v984_v63, %v988_v58  ;;  %v1029_v0 = vmin.f32 %v989_v41, %v990_v31  ;;  %v1034_v37 = vmax.f32 %v990_v31, %v989_v41  ;;  %v1053_v60 = vsel %vm2373_vm4, %v1052_v6, %v1051_v17 }
 0x178   : > { %v1031_v25 = vmin.f32 %v991_v4, %v992_v44  ;;  %v1036_v32 = vmax.f32 %v992_v44, %v991_v4  ;;  %v1054_v59 = vsel %vm2379_vm8, %v1051_v17, %v1050_v13  ;;  %vm3353_vm5 = vnez %v3273_v29 }
 0x179   : > { %v1055_v48 = vsel %vm3353_vm5, %v1050_v13, %v1049_v9  ;;  %vm3354_vm2 = vnez %v3275_v49  ;;  %v1057_v61 = vmin.f32 %v1013_v2, %v1053_v60  ;;  %v1058_v14 = vmin.f32 %v1018_v8, %v1054_v59 }
 0x17a   : > { %v1056_v57 = vsel %vm3354_vm2, %v1049_v9, %v1052_v6  ;;  %vm2810_vm12 = vmxor %vm3334_vm10, %vm3354_vm2  ;;  %v1059_v1 = vmin.f32 %v1015_v35, %v1055_v48  ;;  %v1061_v36 = vmax.f32 %v1013_v2, %v1053_v60  ;;  %v1062_v34 = vmax.f32 %v1018_v8, %v1054_v59 }
 0x17b   : > { %v1060_v46 = vmin.f32 %v1020_v38, %v1056_v57  ;;  %v1063_v12 = vmax.f32 %v1015_v35, %v1055_v48  ;;  %v1064_v42 = vmax.f32 %v1020_v38, %v1056_v57  ;;  %v1069_v22 = vrot.slane %v1029_v0, 4 }
 0x17c   : > { %v1070_v24 = vrot.slane %v1034_v37, 4  ;;  %v1071_v18 = vrot.slane %v1031_v25, 4  ;;  %v1072_v27 = vrot.slane %v1036_v32, 4  ;;  %vm3357_vm14 = vnez %v3295_v7 }
 0x17d   : > { %v2816_v62 = vsel %vm3357_vm14, %v1057_v61, %v1061_v36  ;;  %v2820_v50 = vsel %vm2795_vm1, %v1058_v14, %v1062_v34  ;;  %vm3358_vm13 = vnez %v3298_v15  ;;  %v2828_v2 = vsel %vm2810_vm12, %v1060_v46, %v1064_v42 }
 0x17e   : > { %v2824_v63 = vsel %vm3358_vm13, %v1059_v1, %v1063_v12  ;;  %vm3359_vm7 = vcmp.lt.s32.totalorder %v1783_v23, 4  ;;  %v1097_v26 = vrot.slane %v2816_v62, 6  ;;  %v1098_v13 = vrot.slane %v2820_v50, 6 }
 0x17f   : > { %v1073_v35 = vsel %vm3359_vm7, %v1071_v18, %v1072_v27  ;;  %vm3360_vm6 = vmmov %vm3359_vm7  ;;  %v1099_v20 = vrot.slane %v2824_v63, 6  ;;  %v1100_v29 = vrot.slane %v2828_v2, 6  ;;  %v1105_v15 = vrot.slane %v2816_v62, 2 }
 0x180   : > { %v1074_v8 = vsel %vm3360_vm6, %v1070_v24, %v1071_v18  ;;  %vm3361_vm9 = vmmov %vm3360_vm6  ;;  %v1106_v19 = vrot.slane %v2820_v50, 2  ;;  %v1107_v60 = vrot.slane %v2824_v63, 2  ;;  %v1108_v59 = vrot.slane %v2828_v2, 2 }
 0x181   : > { %v1075_v38 = vsel %vm3361_vm9, %v1069_v22, %v1070_v24  ;;  %vm3362_vm0 = vmmov %vm3360_vm6  ;;  %v1079_v58 = vsel %vm3353_vm5, %v1074_v8, %v1073_v35  ;;  %vm3363_vm6 = vcmp.lt.s32.totalorder %v1783_v23, 2  ;;  %vm3367_vm9 = vcmp.lt.s32.totalorder %v1783_v23, 6 }
 0x182   : > { %v1076_v10 = vsel %vm3362_vm0, %v1072_v27, %v1069_v22  ;;  %v1078_v28 = vsel %vm2379_vm8, %v1075_v38, %v1074_v8  ;;  %v1083_v11 = vmin.f32 %v1031_v25, %v1079_v58  ;;  %v1087_v44 = vmax.f32 %v1031_v25, %v1079_v58  ;;  %vm3364_vm7 = vmmov %vm3363_vm6 }
 0x183   : > { %v1077_v51 = vsel %vm2373_vm4, %v1076_v10, %v1075_v38  ;;  %v1080_v55 = vsel %vm3354_vm2, %v1073_v35, %v1076_v10  ;;  %v1082_v43 = vmin.f32 %v1034_v37, %v1078_v28  ;;  %v1086_v4 = vmax.f32 %v1034_v37, %v1078_v28  ;;  %vm3365_vm0 = vmmov %vm3363_vm6 }
 0x184   : > { %v1081_v39 = vmin.f32 %v1029_v0, %v1077_v51  ;;  %v1084_v41 = vmin.f32 %v1036_v32, %v1080_v55  ;;  %v1085_v31 = vmax.f32 %v1029_v0, %v1077_v51  ;;  %v1088_v9 = vmax.f32 %v1036_v32, %v1080_v55  ;;  %vm3366_vm8 = vmmov %vm3365_vm0 }
 0x185   : > { %v2856_v17 = vsel %vm2795_vm1, %v1082_v43, %v1086_v4  ;;  %v2860_v0 = vsel %vm3358_vm13, %v1083_v11, %v1087_v44  ;;  %v1101_v37 = vsel %vm3363_vm6, %v1099_v20, %v1100_v29  ;;  %v1102_v7 = vsel %vm3364_vm7, %v1098_v13, %v1099_v20  ;;  %vm3368_vm4 = vmmov %vm3367_vm9 }
 0x186   : > { %v2852_v49 = vsel %vm3357_vm14, %v1081_v39, %v1085_v31  ;;  %v2864_v25 = vsel %vm2810_vm12, %v1084_v41, %v1088_v9  ;;  %v1103_v32 = vsel %vm3365_vm0, %v1097_v26, %v1098_v13  ;;  %v1104_v6 = vsel %vm3366_vm8, %v1100_v29, %v1097_v26  ;;  %vm3369_vm13 = vmmov %vm3368_vm4 }
 0x187   : > { %v1129_v48 = vrot.slane %v2852_v49, 6  ;;  %v1130_v57 = vrot.slane %v2856_v17, 6  ;;  %v1131_v54 = vrot.slane %v2860_v0, 6  ;;  %v1132_v61 = vrot.slane %v2864_v25, 6  ;;  %vm3370_vm1 = vmmov %vm3368_vm4 }
 0x188   : > { %v1109_v14 = vsel %vm3367_vm9, %v1107_v60, %v1108_v59  ;;  %v1110_v1 = vsel %vm3368_vm4, %v1106_v19, %v1107_v60  ;;  %v1111_v46 = vsel %vm3369_vm13, %v1105_v15, %v1106_v19  ;;  %v1112_v36 = vsel %vm3370_vm1, %v1108_v59, %v1105_v15  ;;  %vm2893_vm5 = vmxor %vm3334_vm10, %vm3313_vm3 }
 0x189   : > { %v1113_v12 = vsel %vm3310_vm15, %v1104_v6, %v1111_v46  ;;  %v1114_v42 = vsel %vm3313_vm3, %v1103_v32, %v1110_v1  ;;  %v1115_v22 = vsel %vm3314_vm11, %v1102_v7, %v1109_v14  ;;  %vm3373_vm2 = vnez %v3210_v56  ;;  %vm3376_vm14 = vmmov %vm3365_vm0 }
 0x18a   : > { %v1116_v24 = vsel %vm3373_vm2, %v1101_v37, %v1112_v36  ;;  %vm2908_vm12 = vmxor %vm3334_vm10, %vm3373_vm2  ;;  %v1117_v27 = vmin.f32 %v2816_v62, %v1113_v12  ;;  %v1118_v35 = vmin.f32 %v2820_v50, %v1114_v42  ;;  %v1119_v8 = vmin.f32 %v2824_v63, %v1115_v22 }
 0x18b   : > { %v1120_v38 = vmin.f32 %v2828_v2, %v1116_v24  ;;  %v1121_v10 = vmax.f32 %v2816_v62, %v1113_v12  ;;  %v1122_v51 = vmax.f32 %v2820_v50, %v1114_v42  ;;  %v1123_v28 = vmax.f32 %v2824_v63, %v1115_v22  ;;  %vm3377_vm6 = vmmov %vm3365_vm0 }
 0x18c   : > { %v1124_v58 = vmax.f32 %v2828_v2, %v1116_v24  ;;  %v1133_v55 = vsel %vm3376_vm14, %v1131_v54, %v1132_v61  ;;  %v1134_v39 = vsel %vm3377_vm6, %v1130_v57, %v1131_v54  ;;  %vm3378_vm7 = vmmov %vm3365_vm0  ;;  %v1136_v11 = vsel %vm3365_vm0, %v1132_v61, %v1129_v48 }
 0x18d   : > { %v1135_v43 = vsel %vm3378_vm7, %v1129_v48, %v1130_v57  ;;  %vm3379_vm8 = vnez %v3312_v21  ;;  %v2934_v50 = vsel %vm2893_vm5, %v1118_v35, %v1122_v51  ;;  %vm3380_vm9 = vnez %v3317_v47  ;;  %vm3381_vm4 = vmmov %vm3370_vm1 }
 0x18e   : > { %v2930_v62 = vsel %vm3379_vm8, %v1117_v27, %v1121_v10  ;;  %v2938_v63 = vsel %vm3380_vm9, %v1119_v8, %v1123_v28  ;;  %v2942_v2 = vsel %vm2908_vm12, %v1120_v38, %v1124_v58  ;;  %v1137_v41 = vrot.slane %v2852_v49, 2  ;;  %vm3382_vm13 = vmmov %vm3370_vm1 }
 0x18f   : > { %v1138_v31 = vrot.slane %v2856_v17, 2  ;;  %v1139_v4 = vrot.slane %v2860_v0, 2  ;;  %v1140_v44 = vrot.slane %v2864_v25, 2  ;;  %v1165_v9 = vrot.slane %v2930_v62, 7  ;;  %vm3383_vm14 = vmmov %vm3370_vm1 }
 0x190   : > { %v1166_v26 = vrot.slane %v2934_v50, 7  ;;  %v1167_v13 = vrot.slane %v2938_v63, 7  ;;  %v1168_v20 = vrot.slane %v2942_v2, 7  ;;  %v1173_v36 = vrot.slane %v2930_v62, 1 }
 0x191   : > { %v1141_v29 = vsel %vm3381_vm4, %v1139_v4, %v1140_v44  ;;  %v1142_v37 = vsel %vm3382_vm13, %v1138_v31, %v1139_v4  ;;  %v1143_v7 = vsel %vm3370_vm1, %v1137_v41, %v1138_v31  ;;  %v1144_v32 = vsel %vm3383_vm14, %v1140_v44, %v1137_v41 }
 0x192   : > { %v1145_v6 = vsel %vm3310_vm15, %v1136_v11, %v1143_v7  ;;  %v1146_v15 = vsel %vm3313_vm3, %v1135_v43, %v1142_v37  ;;  %v1147_v19 = vsel %vm3314_vm11, %v1134_v39, %v1141_v29  ;;  %v1148_v60 = vsel %vm3373_vm2, %v1133_v55, %v1144_v32 }
 0x193   : > { %v1149_v59 = vmin.f32 %v2852_v49, %v1145_v6  ;;  %v1150_v48 = vmin.f32 %v2856_v17, %v1146_v15  ;;  %v1151_v57 = vmin.f32 %v2860_v0, %v1147_v19  ;;  %v1152_v54 = vmin.f32 %v2864_v25, %v1148_v60 }
 0x194   : > { %v1153_v33 = vmax.f32 %v2852_v49, %v1145_v6  ;;  %v1154_v61 = vmax.f32 %v2856_v17, %v1146_v15  ;;  %v1155_v16 = vmax.f32 %v2860_v0, %v1147_v19  ;;  %v1156_v3 = vmax.f32 %v2864_v25, %v1148_v60 }
 0x195   : > { %vm3384_vm15 = vcmp.lt.s32.totalorder %v1783_v23, 1  ;;  %v1174_v12 = vrot.slane %v2934_v50, 1  ;;  %v1175_v42 = vrot.slane %v2938_v63, 1  ;;  %v1176_v22 = vrot.slane %v2942_v2, 1 }
 0x196   : > { %v1169_v56 = vsel %vm3384_vm15, %v1167_v13, %v1168_v20  ;;  %vm3385_vm3 = vmmov %vm3384_vm15  ;;  %v1157_v49 = vsel %vm3379_vm8, %v1149_v59, %v1153_v33  ;;  %v1158_v17 = vsel %vm2893_vm5, %v1150_v48, %v1154_v61  ;;  %v1159_v0 = vsel %vm3380_vm9, %v1151_v57, %v1155_v16 }
 0x197   : > { %v1170_v14 = vsel %vm3385_vm3, %v1166_v26, %v1167_v13  ;;  %vm3386_vm11 = vmmov %vm3385_vm3  ;;  %v1160_v25 = vsel %vm2908_vm12, %v1152_v54, %v1156_v3  ;;  %v1197_v24 = vrot.slane %v1157_v49, 7  ;;  %v1198_v21 = vrot.slane %v1158_v17, 7 }
 0x198   : > { %v1171_v1 = vsel %vm3386_vm11, %v1165_v9, %v1166_v26  ;;  %vm3387_vm2 = vmmov %vm3385_vm3  ;;  %v1199_v27 = vrot.slane %v1159_v0, 7  ;;  %v1200_v35 = vrot.slane %v1160_v25, 7  ;;  %vm3388_vm5 = vcmp.lt.s32.totalorder %v1783_v23, 7 }
 0x199   : > { %v1172_v46 = vsel %vm3387_vm2, %v1168_v20, %v1165_v9  ;;  %v1177_v34 = vsel %vm3388_vm5, %v1175_v42, %v1176_v22  ;;  %vm3389_vm6 = vmmov %vm3388_vm5  ;;  %vm3392_vm0 = vnez %v3196_v40  ;;  %vm3393_vm8 = vnez %v3188_v5 }
 0x19a   : > { %v1178_v47 = vsel %vm3389_vm6, %v1174_v12, %v1175_v42  ;;  %vm3390_vm12 = vmmov %vm3388_vm5  ;;  %vm3394_vm9 = vnez %v3198_v52  ;;  %vm3395_vm4 = vnez %v3200_v53  ;;  %v1205_v44 = vrot.slane %v1157_v49, 1 }
 0x19b   : > { %v1179_v18 = vsel %vm3390_vm12, %v1173_v36, %v1174_v12  ;;  %vm3391_vm7 = vmmov %vm3388_vm5  ;;  %v1182_v10 = vsel %vm3393_vm8, %v1171_v1, %v1178_v47  ;;  %v1183_v51 = vsel %vm3394_vm9, %v1170_v14, %v1177_v34  ;;  %v1206_v9 = vrot.slane %v1158_v17, 1 }
 0x19c   : > { %v1180_v8 = vsel %vm3391_vm7, %v1176_v22, %v1173_v36  ;;  %v1181_v38 = vsel %vm3392_vm0, %v1172_v46, %v1179_v18  ;;  %v1186_v55 = vmin.f32 %v2934_v50, %v1182_v10  ;;  %v1187_v39 = vmin.f32 %v2938_v63, %v1183_v51  ;;  %vm3396_vm13 = vmmov %vm3387_vm2  ;;  %v1248_v18 = vld [vmem:[%s1769_s15] sm:$0x1] }
 0x19d   : > { %v1184_v28 = vsel %vm3395_vm4, %v1169_v56, %v1180_v8  ;;  %v1185_v58 = vmin.f32 %v2930_v62, %v1181_v38  ;;  %v1201_v11 = vsel %vm3396_vm13, %v1199_v27, %v1200_v35  ;;  %vm3397_vm1 = vmmov %vm3387_vm2  ;;  %v1207_v26 = vrot.slane %v1159_v0, 1 }
 0x19e   : > { %v1188_v43 = vmin.f32 %v2942_v2, %v1184_v28  ;;  %v1202_v41 = vsel %vm3397_vm1, %v1198_v21, %v1199_v27  ;;  %vm3398_vm14 = vmmov %vm3397_vm1  ;;  %v1208_v13 = vrot.slane %v1160_v25, 1  ;;  %v1189_v20 = vmax.f32 %v2930_v62, %v1181_v38 }
 0x19f   : > { %v1203_v31 = vsel %vm3398_vm14, %v1197_v24, %v1198_v21  ;;  %vm3399_vm15 = vmmov %vm3397_vm1  ;;  %v1190_v29 = vmax.f32 %v2934_v50, %v1182_v10  ;;  %v1191_v37 = vmax.f32 %v2938_v63, %v1183_v51  ;;  %v1192_v7 = vmax.f32 %v2942_v2, %v1184_v28 }
 0x1a0   : > { %v1204_v4 = vsel %vm3399_vm15, %v1200_v35, %v1197_v24  ;;  %vm3400_vm3 = vmmov %vm3388_vm5  ;;  %vm3406_vm7 = vnez %v3336_v45 }
 0x1a1   : > { %v1209_v32 = vsel %vm3400_vm3, %v1207_v26, %v1208_v13  ;;  %vm3401_vm11 = vmmov %vm3400_vm3  ;;  %v1193_v5 = vsel %vm3406_vm7, %v1185_v58, %v1189_v20 }
 0x1a2   : > { %v1210_v6 = vsel %vm3401_vm11, %v1206_v9, %v1207_v26  ;;  %vm3402_vm2 = vmmov %vm3400_vm3  ;;  %v1215_v2 = vsel %vm3394_vm9, %v1202_v41, %v1209_v32 }
 0x1a3   : > { %v1211_v15 = vsel %vm3402_vm2, %v1205_v44, %v1206_v9  ;;  %vm3403_vm5 = vmmov %vm3402_vm2  ;;  %v1214_v63 = vsel %vm3393_vm8, %v1203_v31, %v1210_v6  ;;  %v1219_v48 = vmin.f32 %v1159_v0, %v1215_v2  ;;  %v1223_v61 = vmax.f32 %v1159_v0, %v1215_v2 }
 0x1a4   : > { %v1212_v19 = vsel %vm3403_vm5, %v1208_v13, %v1205_v44  ;;  %vm3039_vm6 = vmxor %vm3334_vm10, %vm3393_vm8  ;;  %v1213_v50 = vsel %vm3392_vm0, %v1204_v4, %v1211_v15  ;;  %v1218_v59 = vmin.f32 %v1158_v17, %v1214_v63  ;;  %v1222_v33 = vmax.f32 %v1158_v17, %v1214_v63 }
 0x1a5   : > { %v1216_v23 = vsel %vm3395_vm4, %v1201_v11, %v1212_v19  ;;  %v1217_v60 = vmin.f32 %v1157_v49, %v1213_v50  ;;  %v1221_v54 = vmax.f32 %v1157_v49, %v1213_v50  ;;  %vm1164_vm12 = vmxor %vm3334_vm10, %vm3395_vm4  ;;  %v1194_v40 = vsel %vm3039_vm6, %v1186_v55, %v1190_v29 }
 0x1a6   : > { %v1220_v57 = vmin.f32 %v1160_v25, %v1216_v23  ;;  %v1224_v16 = vmax.f32 %v1160_v25, %v1216_v23  ;;  %vm3407_vm0 = vnez %v3338_v30  ;;  %v1226_v56 = vsel %vm3039_vm6, %v1218_v59, %v1222_v33 }
 0x1a7   : > { %v1195_v52 = vsel %vm3407_vm0, %v1187_v39, %v1191_v37  ;;  %v1225_v3 = vsel %vm3406_vm7, %v1217_v60, %v1221_v54  ;;  %v1227_v53 = vsel %vm3407_vm0, %v1219_v48, %v1223_v61  ;;  %v1230_v46 = vsub.f32 %v1194_v40, %v1226_v56 }
 0x1a8   : > { %v1228_v14 = vsel %vm1164_vm12, %v1220_v57, %v1224_v16  ;;  %v1229_v1 = vsub.f32 %v1193_v5, %v1225_v3  ;;  %v1231_v49 = vsub.f32 %v1195_v52, %v1227_v53  ;;  %v1196_v17 = vsel %vm1164_vm12, %v1188_v43, %v1192_v7 }
 0x1a9   : > { %v1232_v0 = vsub.f32 %v1196_v17, %v1228_v14  ;;  %v1234_v36 = vmul.f32 %v1230_v46, %v1230_v46 }
 0x1aa   : > { %v1233_v25 = vmul.f32 %v1229_v1, %v1229_v1  ;;  %v1235_v12 = vmul.f32 %v1231_v49, %v1231_v49 }
 0x1ab   : > { %v1236_v45 = vmul.f32 %v1232_v0, %v1232_v0 }
 0x1ac   : > { %v1237_v42 = vadd.f32 %v1234_v36, %v1233_v25 }
 0x1ae   : > { %v1238_v22 = vadd.f32 %v1237_v42, %v1235_v12 }
 0x1b0   : > { %v1239_v24 = vadd.f32 %v1238_v22, %v1236_v45 }
 0x1b2   : > { %v1240_v21 = vrot.slane %v1239_v24, 4 }
 0x1b4   : > { %v1241_v27 = vadd.f32 %v1240_v21, %v1239_v24 }
 0x1b6   : > { %v1242_v35 = vrot.slane %v1241_v27, 2 }
 0x1b8   : > { %v1243_v30 = vadd.f32 %v1242_v35, %v1241_v27 }
 0x1ba   : > { %v1244_v34 = vrot.slane %v1243_v30, 1 }
 0x1bc   : > { %v1245_v47 = vadd.f32 %v1244_v34, %v1243_v30 }
 0x1be   : > { %1246 = vadd.xlane.f32.xlu0 %v1245_v47 }
 0x248   : > { %1254 = sbr.rel (%p1391_p5) target bundleno = 601 (0x259), region = 81 }
 0x24b   : > { %v1247_v8 = vpop.xlane.xlu0 %1246 }
 0x24c   : > { %v1249_v38 = vadd.f32 %v1248_v18, %v1247_v8 }
 0x24e   : > { %1250 = vst [vmem:[%s1769_s15] sm:$0x1] %v1249_v38 }
 0x255   : > { %v1255_v10 = vld [vmem:[%s1769_s15] sm:$0x1] }
 0x256   : > { %v1256_v51 = vmul.f32 0.0026041667, %v1255_v10 }
 0x258   : > { %1257 = vst [vmem:[%s1769_s15] sm:$0x1] %v1256_v51 }
 0x259 PF: > { %s1392_s2 = sshll.u32 %s1612_s18, 4  ;;  %s1271_s11 = sshll.u32 %s1769_s15, 4  ;;  %s1272_s11 = int_to_ptr.vmem [resolvable:$true] %s1271_s11 }
 0x25a   : > { %s3075_s10 = scalar_lea.hbm %s3134_s3, %s1392_s2  ;;  %s1259_s17 = scalar_lea.sflag [#allocation4], %s264_s5 }
 0x25b   : > { %s1514_s22 = scalar_lea.vmem %s1272_s11, 16  ;;  %s1631_s23 = smov [#allocation3]  }
 0x25c   : > { %p1515_p6 = scmp.ne.s32.totalorder %s1272_s11, %s1514_s22  ;;  %s1518_s27 = sshll.u32 %s1631_s23, 4  ;;  %s1519_s27 = int_to_ptr.vmem [resolvable:$false] %s1518_s27 }
 0x25d   : > { %s1520_s4 = scalar_lea.vmem %s1519_s27, 32  ;;  %p1521_p10 = scmp.lt.s32.totalorder %s1272_s11, %s1519_s27 }
 0x25e   : > { %p1516_p8 = pnand %p1515_p6, %p1724_p7  ;;  %p1522_p11 = scmp.lt.s32.totalorder %s1520_s4, %s1514_s22 }
 0x260   : > { %p1517_p9 = pneg %p1516_p8  ;;  %p1523_p13 = por %p1522_p11, %p1521_p10 }
 0x262   : > { %p1524_p0 = pnand %p1523_p13, %p1517_p9 }
 0x264   : > { %1527 = shalt.err (!%p1524_p0)
}
 0x265   : > { %s1528_s18 = scalar_lea.hbm %s3075_s10, 16  ;;  %s1532_s26 = scalar_lea.hbm %s3134_s3, 32 }
 0x266   : > { %p1529_p1 = scmp.ne.s32.totalorder %s3075_s10, %s1528_s18  ;;  %p1533_p4 = scmp.lt.u32.totalorder %s3075_s10, %s3134_s3 }
 0x267   : > { %p1534_p5 = scmp.lt.u32.totalorder %s1532_s26, %s1528_s18  ;;  %p1536_p8 = scmp.lt.u32.totalorder %s1528_s18, %s3075_s10 }
 0x268   : > { %p1530_p2 = pnand %p1529_p1, %p1724_p7 }
 0x269   : > { %p1535_p6 = por %p1534_p5, %p1533_p4 }
 0x26a   : > { %p1531_p3 = pneg %p1530_p2 }
 0x26b   : > { %p1537_p9 = por %p1536_p8, %p1535_p6 }
 0x26d   : > { %p1538_p10 = pnand %p1537_p9, %p1531_p3 }
 0x26f   : > { %1541 = shalt.err (!%p1538_p10)
}
 0x270   : > { %1398 = dma.vmem_to_hbm [thread:$0]  (%p1724_p7), %s1272_s11, 16, %s3075_s10, %s1259_s17  }
 0x271 PF: > { %p1404_p11 = scmp.ge.s32.totalorder %s1624_s21, 2  ;;  %s1283_s28 = sand.u32 1, %s1588_s12  }
 0x272   : > { %s1284_s9 = scalar_lea.sflag [#allocation4], %s1283_s28 }
 0x273   : > { %p1401_p13 = pnand %p1404_p11, %p1732_p12 }
 0x275   : > { %1583 = dma.done.wait (!%p1401_p13), %s1284_s9, 16  }
 0x276   : > { %1585 = vsyncadd (!%p1401_p13), %s1284_s9, 4294967280  ;;  %s16_s21 = sadd.s32 1, %s1624_s21   ;;  %s3408_s12 = smov %s1592_s13 }
 0x277   : > { %p13_p0 = scmp.ge.s32.totalorder %s16_s21, 8   ;;  %s3409_s13 = smov %s1596_s14 }
 0x278   : > { %s3410_s14 = smov %s1737_s7  ;;  %s3411_s15 = smov %s1604_s16 }
 0x279   : > { %s3412_s16 = smov %s1740_s8  ;;  %s3413_s17 = smov %s1616_s19 }
 0x27a   : > { %s3414_s18 = smov %s1620_s20  ;;  %s3415_s19 = smov %s3418_s24 }
 0x27b   : > { %s3416_s20 = smov %s3422_s25  ;;  %15 = sbr.rel (!%p13_p0) target bundleno = 8 (0x8), region = 130 }
 0x282   :  { %1288 = vsyncpa [#allocation4], 1 }
 0x283   :  { %1290 = vsyncpa [#allocation4 + $0x1], 1 }

</bundles_post_ra>
